<compile_context>
chip_gen: v5e
topology: v5e:2x2
jax: 0.10.0
libtpu: 0.0.40
codegen_flags: <defaults>
</compile_context>

<pallas_src>
import functools

import jax
import jax.numpy as jnp
from jax.experimental import pallas as pl
from jax.experimental.pallas import tpu as pltpu


# ------------------------------ helpers ------------------------------------


def _pick_tile(dim, candidates):
    """Largest candidate tile that evenly divides `dim`, else the full dim."""
    for c in candidates:
        if c <= dim and dim % c == 0:
            return c
    return dim


def _vmem_capacity_bytes():
    try:
        return int(pltpu.get_tpu_info().vmem_capacity_bytes)
    except Exception:
        return 64 * 1024 * 1024   # conservative (v7x per-TensorCore VMEM)


# --------------------------- tiled linear kernel -----------------------------


def _matmul_kernel(x_ref, w_ref, o_ref, acc_ref):
    @pl.when(pl.program_id(2) == 0)
    def _init():
        acc_ref[...] = jnp.zeros_like(acc_ref)

    acc_ref[...] += jnp.dot(x_ref[...], w_ref[...],
                            preferred_element_type=jnp.float32)

    @pl.when(pl.program_id(2) == pl.num_programs(2) - 1)
    def _fin():
        o_ref[...] = acc_ref[...].astype(o_ref.dtype)


def pallas_linear(x2d, w):
    """y = x2d @ w. Tiled matmul, operands in their own (bf16) dtype, fp32 acc."""
    M, K = x2d.shape
    _, N = w.shape
    tm = _pick_tile(M, (512, 256, 128, 64, 32, 16, 8))
    tn = _pick_tile(N, (512, 256, 128))
    tk = _pick_tile(K, (512, 256, 128))
    grid = (M // tm, N // tn, K // tk)
    return pl.pallas_call(
        _matmul_kernel,
        out_shape=jax.ShapeDtypeStruct((M, N), x2d.dtype),
        grid=grid,
        in_specs=[pl.BlockSpec((tm, tk), lambda i, j, k: (i, k)),
                  pl.BlockSpec((tk, tn), lambda i, j, k: (k, j))],
        out_specs=pl.BlockSpec((tm, tn), lambda i, j, k: (i, j)),
        scratch_shapes=[pltpu.VMEM((tm, tn), jnp.float32)],
        compiler_params=pltpu.CompilerParams(
            dimension_semantics=("parallel", "parallel", "arbitrary")),
    )(x2d, w)


# --------------------------- prefix attention kernel -------------------------


def _prefix_attn_kernel(*refs, num_heads, head_dim, scale, has_bias):
    if has_bias:
        (q_ref, k_ref, v_ref, kp_ref, vp_ref, bias_ref, mask_ref,
         pw_ref, pb_ref, o_ref, kx_s, vx_s) = refs
    else:
        (q_ref, k_ref, v_ref, kp_ref, vp_ref, mask_ref,
         pw_ref, pb_ref, o_ref, kx_s, vx_s) = refs
        bias_ref = None

    H, hd = num_heads, head_dim

    # K/V head relayout hoisted out of the per-q-tile path: the K/V blocks only
    # change when the batch index (outer grid axis) changes, so relayout them
    # into (H, N, hd) scratch once per batch element and reuse across q tiles.
    @pl.when(pl.program_id(1) == 0)
    def _relayout_kv():
        for h in range(H):
            kx_s[h] = k_ref[0, :, h * hd:(h + 1) * hd]
            vx_s[h] = v_ref[0, :, h * hd:(h + 1) * hd]

    neg_mask = mask_ref[0]                         # (1, N) additive f32 key mask

    def qk(a, b):                                  # (m, d) x (n, d) -> (m, n)
        return jax.lax.dot_general(a, b, (((1,), (1,)), ((), ())),
                                   preferred_element_type=jnp.float32)

    # Static head loop: peak f32 score/exp temporaries are (tq, N) per head
    # instead of (H, tq, N).
    head_outs = []
    for h in range(H):
        q_h = q_ref[0, :, h * hd:(h + 1) * hd] * scale      # (tq, hd)
        k_h = kx_s[h]                                        # (N, hd)
        v_h = vx_s[h]                                        # (N, hd)

        s_x = qk(q_h, k_h) + neg_mask                        # (tq, N)  f32
        if has_bias:
            s_x = s_x + bias_ref[h].astype(jnp.float32)
        s_p = qk(q_h, kp_ref[h])                             # (tq, P)  f32

        # Joint softmax over prefix + x keys: two blocks, no concatenation.
        m = jnp.maximum(jnp.max(s_x, axis=-1, keepdims=True),
                        jnp.max(s_p, axis=-1, keepdims=True))
        e_x = jnp.exp(s_x - m)
        e_p = jnp.exp(s_p - m)
        l = (jnp.sum(e_x, axis=-1, keepdims=True)
             + jnp.sum(e_p, axis=-1, keepdims=True))

        # Deferred normalization: un-normalized PV matmuls (probabilities cast
        # to the K/V dtype for the MXU), one reciprocal multiply on (tq, hd).
        o_h = (jnp.dot(e_p.astype(vp_ref.dtype), vp_ref[h],
                       preferred_element_type=jnp.float32)
               + jnp.dot(e_x.astype(v_h.dtype), v_h,
                         preferred_element_type=jnp.float32))
        o_h = o_h * pl.reciprocal(l, approx=True)            # (tq, hd) f32
        head_outs.append(o_h)

    o = jnp.concatenate(head_outs, axis=-1)                  # (tq, C) f32

    # Fused output projection (proj weight/bias resident in VMEM).
    o = (jnp.dot(o.astype(pw_ref.dtype), pw_ref[...],
                 preferred_element_type=jnp.float32) + pb_ref[...])
    o_ref[0] = o.astype(o_ref.dtype)                          # lane-dense store


def _attn_vmem_plan(N, C, H, P, kv_item, bias_item, out_item):
    """Pick the query tile so the per-step working set fits comfortably in
    VMEM on every TPU generation (64 MiB/TensorCore on v7x)."""
    hd = C // H
    cap = _vmem_capacity_bytes()
    budget = cap // 2
    fixed = (2 * (2 * N * C * kv_item)          # k + v column blocks (dbuf)
             + 2 * (2 * H * P * hd * kv_item)   # key/value prompts (dbuf)
             + 2 * N * 4                        # additive key mask (dbuf)
             + 2 * (C * C * kv_item + C * 4)    # resident proj weight/bias
             + 2 * H * N * hd * kv_item)        # kx/vx relayout scratch

    def per_step(t):
        return (2 * t * C * kv_item             # q column block (dbuf)
                + 2 * t * C * out_item          # fused output block (dbuf)
                + 2 * H * t * N * bias_item     # rel-pos bias block (dbuf)
                + 6 * t * N * 4                 # per-head f32 score/exp temps
                + 4 * t * C * 4)                # head-concat + proj temps

    divisors = [t for t in (256, 128, 64, 32, 16, 8) if t <= N and N % t == 0]
    if not divisors:
        divisors = [N]
    tq = divisors[-1]
    for t in divisors:
        if fixed + per_step(t) <= budget:
            tq = t
            break
    est = fixed + per_step(tq)
    vmem_limit = int(min(cap - (16 << 20), max(48 << 20, 2 * est)))
    return tq, vmem_limit


def pallas_prefix_attention(qkv, key_prompts, val_prompts, bias, neg_mask,
                            proj_w, proj_b, *, num_heads, scale, out_dtype):
    B, N, threeC = qkv.shape
    C = threeC // 3
    H = num_heads
    hd = C // H
    P = key_prompts.shape[1]

    kv_item = jnp.dtype(qkv.dtype).itemsize
    bias_item = jnp.dtype(bias.dtype).itemsize if bias is not None else 0
    out_item = jnp.dtype(out_dtype).itemsize
    tq, vmem_limit = _attn_vmem_plan(N, C, H, P, kv_item, bias_item, out_item)

    has_bias = bias is not None
    kernel = functools.partial(_prefix_attn_kernel, num_heads=H, head_dim=hd,
                               scale=scale, has_bias=has_bias)

    # Column-blocked views of the fused (B, N, 3C) qkv tensor: only the needed
    # C columns of each of q / k / v are DMA'd.
    in_specs = [
        pl.BlockSpec((1, tq, C), lambda b, qi: (b, qi, 0)),   # q tile
        pl.BlockSpec((1, N, C), lambda b, qi: (b, 0, 1)),     # all x keys
        pl.BlockSpec((1, N, C), lambda b, qi: (b, 0, 2)),     # all x values
        pl.BlockSpec((H, P, hd), lambda b, qi: (0, 0, 0)),    # key prompts
        pl.BlockSpec((H, P, hd), lambda b, qi: (0, 0, 0)),    # value prompts
    ]
    args = [qkv, qkv, qkv, key_prompts, val_prompts]
    if has_bias:
        in_specs.append(pl.BlockSpec((H, tq, N), lambda b, qi: (0, qi, 0)))
        args.append(bias)
    in_specs += [
        pl.BlockSpec((1, 1, N), lambda b, qi: (b, 0, 0)),     # additive key mask
        pl.BlockSpec((C, C), lambda b, qi: (0, 0)),           # proj weight
        pl.BlockSpec((1, C), lambda b, qi: (0, 0)),           # proj bias
    ]
    args += [neg_mask, proj_w, proj_b]

    return pl.pallas_call(
        kernel,
        out_shape=jax.ShapeDtypeStruct((B, N, C), out_dtype),
        grid=(B, N // tq),
        in_specs=in_specs,
        out_specs=pl.BlockSpec((1, tq, C), lambda b, qi: (b, qi, 0)),
        scratch_shapes=[pltpu.VMEM((H, N, hd), qkv.dtype),
                        pltpu.VMEM((H, N, hd), qkv.dtype)],
        compiler_params=pltpu.CompilerParams(
            # the q-tile axis carries the per-batch K/V scratch -> 'arbitrary';
            # the batch axis stays 'parallel' for megacore / v7x's 2 TCs.
            dimension_semantics=("parallel", "arbitrary"),
            vmem_limit_bytes=vmem_limit),
    )(*args)


# --------------------------- forward (glue + kernels) ------------------------


def moe_prefix_attention_forward(x, params, mask=None,
                                 relative_position_bias=None, *,
                                 num_heads, prefix_length,
                                 modality_type='text',
                                 compute_dtype=jnp.bfloat16):
    """Pallas implementation of MoEPrefixAttention.forward (text/image path)."""
    B, N, C = x.shape
    H = num_heads
    hd = C // H
    P = prefix_length
    scale = hd ** -0.5
    out_dtype = x.dtype
    assert C % H == 0
    assert C % 128 == 0, (
        "lane-aligned column blocking of the fused qkv tensor requires the "
        "embedding dim to be a multiple of 128 (true for real VLMo configs)")

    # Pad long, non-128-aligned sequences (e.g. ViT N=197) so the query axis
    # tiles cleanly and stores stay lane-dense; pad keys are masked out.
    N0 = N
    if N > 128 and N % 128 != 0:
        pad = (-N) % 128
        x = jnp.pad(x, ((0, 0), (0, pad), (0, 0)))
        if mask is None:
            mask = jnp.ones((B, N0), x.dtype)
        mask = jnp.pad(mask, ((0, 0), (0, pad)))
        if relative_position_bias is not None:
            relative_position_bias = jnp.pad(relative_position_bias,
                                             ((0, 0), (0, pad), (0, pad)))
        N = N0 + pad

    cdt = compute_dtype

    # fused qkv projection (qkv_bias=False): bf16 operands, f32 accumulation.
    qkv = pallas_linear(x.reshape(B * N, C).astype(cdt),
                        params['qkv_w_t'].astype(cdt))        # (B*N, 3C)
    qkv = qkv.reshape(B, N, 3 * C)                            # pure reshape

    # prefix prompts: embedding rows (P, 2C) split into key/value and
    # flat-reshaped to (H, P, hd), matching the PyTorch .reshape quirk.
    prompt_w = params['prompts'][modality_type]
    key_prompts = prompt_w[:, :C].reshape(H, P, hd).astype(cdt)
    val_prompts = prompt_w[:, C:].reshape(H, P, hd).astype(cdt)

    # rel-pos bias streamed as bf16 (halves its HBM traffic), upcast in-kernel.
    bias = (None if relative_position_bias is None
            else relative_position_bias.astype(jnp.bfloat16))

    if mask is None:
        neg_mask = jnp.zeros((B, 1, N), jnp.float32)
    else:
        neg_mask = jnp.where(mask > 0.5, 0.0, -1e30)
        neg_mask = neg_mask.astype(jnp.float32).reshape(B, 1, N)

    out = pallas_prefix_attention(
        qkv, key_prompts, val_prompts, bias, neg_mask,
        params['proj_w_t'].astype(cdt),
        params['proj_b'].astype(jnp.float32).reshape(1, C),
        num_heads=H, scale=scale, out_dtype=out_dtype)

    if N != N0:
        out = out[:, :N0]
    return out


# ------------------------------- reference ----------------------------------


def _reference_forward(x, params, mask, rpb, modality_type, num_heads,
                       prefix_length):
    B, N, C = x.shape
    H, P = num_heads, prefix_length
    hd = C // H
    scale = hd ** -0.5
    qkv = x @ params['qkv_w_t']
    qkv = qkv.reshape(B, N, 3, H, hd).transpose(2, 0, 3, 1, 4)
    q, k, v = qkv[0], qkv[1], qkv[2]
    prompt_w = params['prompts'][modality_type]
    kp = jnp.broadcast_to(prompt_w[:, :C].reshape(H, P, hd)[None], (B, H, P, hd))
    vp = jnp.broadcast_to(prompt_w[:, C:].reshape(H, P, hd)[None], (B, H, P, hd))
    k = jnp.concatenate([kp, k], axis=2)
    v = jnp.concatenate([vp, v], axis=2)
    q = q * scale
    attn = jnp.einsum('bhnd,bhmd->bhnm', q.astype(jnp.float32),
                      k.astype(jnp.float32))
    if rpb is not None:
        bias = jnp.concatenate([jnp.zeros((H, N, P), jnp.float32),
                                rpb.astype(jnp.float32)], axis=-1)
        attn = attn + bias[None]
    if mask is not None:
        full_mask = jnp.concatenate([jnp.ones((B, P)), mask], axis=-1) > 0.5
        attn = jnp.where(full_mask[:, None, None, :], attn, -jnp.inf)
    attn = jax.nn.softmax(attn, axis=-1).astype(x.dtype)
    o = jnp.einsum('bhnm,bhmd->bhnd', attn, v)
    o = o.transpose(0, 2, 1, 3).reshape(B, N, C)
    return o @ params['proj_w_t'] + params['proj_b']


# --------------------------------- main --------------------------------------


if __name__ == "__main__":
    B, N, C = 2, 8, 128      # C multiple of 128 for lane-aligned qkv column blocks
    H, P = 4, 4

    key = jax.random.PRNGKey(0)
    ks = jax.random.split(key, 8)

    # Weights pre-transposed ONCE here (outside the traced function).
    qkv_w = 0.05 * jax.random.normal(ks[0], (3 * C, C), jnp.float32)
    proj_w = 0.05 * jax.random.normal(ks[1], (C, C), jnp.float32)

    params = {
        'qkv_w_t': qkv_w.T,                 # (C, 3C)
        'proj_w_t': proj_w.T,               # (C, C)
        'proj_b': 0.01 * jax.random.normal(ks[2], (C,), jnp.float32),
        'prompts': {
            'text': 0.1 * jax.random.normal(ks[3], (P, 2 * C), jnp.float32),
            'image': 0.1 * jax.random.normal(ks[4], (P, 2 * C), jnp.float32),
        },
    }

    x = jax.random.normal(ks[5], (B, N, C), jnp.float32)
    mask = (jax.random.uniform(ks[6], (B, N)) > 0.3).astype(jnp.float32)
    rpb = 0.1 * jax.random.normal(ks[7], (H, N, N), jnp.float32)

    # text modality, with mask + relative position bias
    fwd = jax.jit(functools.partial(moe_prefix_attention_forward,
                                    num_heads=H, prefix_length=P,
                                    modality_type='text'))
    out = jax.block_until_ready(fwd(x, params, mask, rpb))
    ref = _reference_forward(x, params, mask, rpb, 'text', H, P)
    assert out.shape == (B, N, C)
    assert jnp.all(jnp.isfinite(out))
    assert jnp.allclose(out, ref, rtol=2e-2, atol=2e-2), \
        float(jnp.max(jnp.abs(out - ref)))

    # image modality, no mask / no bias (exercises the no-bias kernel variant)
    fwd2 = jax.jit(functools.partial(moe_prefix_attention_forward,
                                     num_heads=H, prefix_length=P,
                                     modality_type='image'))
    out2 = jax.block_until_ready(fwd2(x, params, None, None))
    ref2 = _reference_forward(x, params, None, None, 'image', H, P)
    assert jnp.all(jnp.isfinite(out2))
    assert jnp.allclose(out2, ref2, rtol=2e-2, atol=2e-2), \
        float(jnp.max(jnp.abs(out2 - ref2)))

    print("KERNEL_OK")
</pallas_src>

<mosaic_0001>
module attributes {stable_mosaic.version = 11 : i64} {
  func.func @_matmul_kernel(%arg0: i32, %arg1: i32, %arg2: i32, %arg3: memref<16x128xbf16, #tpu.memory_space<vmem>>, %arg4: memref<128x128xbf16, #tpu.memory_space<vmem>>, %arg5: memref<16x128xbf16, #tpu.memory_space<vmem>>, %arg6: memref<16x128xf32, #tpu.memory_space<vmem>>) attributes {dimension_semantics = [#tpu.dimension_semantics<parallel>, #tpu.dimension_semantics<parallel>, #tpu.dimension_semantics<arbitrary>], iteration_bounds = array<i64: 1, 3, 1>, scalar_prefetch = 0 : i64, scratch_operands = 1 : i64, tpu.core_type = #tpu.core_type<tc>, window_params = [{transform_indices = @transform_0, window_bounds = array<i64: 16, 128>}, {transform_indices = @transform_1, window_bounds = array<i64: 128, 128>}, {transform_indices = @transform_2, window_bounds = array<i64: 16, 128>}]} {
    %c0_i32 = arith.constant 0 : i32
    %0 = arith.cmpi eq, %arg2, %c0_i32 : i32
    %1 = arith.extui %0 : i1 to i32
    %c0_i32_0 = arith.constant 0 : i32
    %2 = arith.cmpi ne, %1, %c0_i32_0 : i32
    scf.if %2 {
      %cst_10 = arith.constant 0.000000e+00 : f32
      %12 = vector.broadcast %cst_10 : f32 to vector<16x128xf32>
      %c0_11 = arith.constant 0 : index
      %c0_12 = arith.constant 0 : index
      %13 = vector.load %arg6[%c0_11, %c0_12] : memref<16x128xf32, #tpu.memory_space<vmem>>, vector<16x128xf32>
      tpu.vector_store %arg6[%c0_11, %c0_12], %12 {strides = array<i32>} : memref<16x128xf32, #tpu.memory_space<vmem>>, vector<16x128xf32>,
    } else {
    }
    %c0 = arith.constant 0 : index
    %c0_1 = arith.constant 0 : index
    %3 = vector.load %arg6[%c0, %c0_1] : memref<16x128xf32, #tpu.memory_space<vmem>>, vector<16x128xf32>
    %c0_2 = arith.constant 0 : index
    %c0_3 = arith.constant 0 : index
    %4 = vector.load %arg3[%c0_2, %c0_3] : memref<16x128xbf16, #tpu.memory_space<vmem>>, vector<16x128xbf16>
    %c0_4 = arith.constant 0 : index
    %c0_5 = arith.constant 0 : index
    %5 = vector.load %arg4[%c0_4, %c0_5] : memref<128x128xbf16, #tpu.memory_space<vmem>>, vector<128x128xbf16>
    %cst = arith.constant dense<0.000000e+00> : vector<16x128xf32>
    %6 = tpu.matmul %4, %5, %cst {dimension_numbers = #tpu.dot_dimension_numbers<[1], [0], [0], [1], [0, 0, 1, 1], [], []>} : vector<16x128xbf16>, vector<128x128xbf16>, vector<16x128xf32> -> vector<16x128xf32>
    %7 = arith.addf %3, %6 : vector<16x128xf32>
    %c0_6 = arith.constant 0 : index
    %c0_7 = arith.constant 0 : index
    %8 = vector.load %arg6[%c0_6, %c0_7] : memref<16x128xf32, #tpu.memory_space<vmem>>, vector<16x128xf32>
    tpu.vector_store %arg6[%c0_6, %c0_7], %7 {strides = array<i32>} : memref<16x128xf32, #tpu.memory_space<vmem>>, vector<16x128xf32>,
    %c0_i32_8 = arith.constant 0 : i32
    %9 = arith.cmpi eq, %arg2, %c0_i32_8 : i32
    %10 = arith.extui %9 : i1 to i32
    %c0_i32_9 = arith.constant 0 : i32
    %11 = arith.cmpi ne, %10, %c0_i32_9 : i32
    scf.if %11 {
      %c0_10 = arith.constant 0 : index
      %c0_11 = arith.constant 0 : index
      %12 = vector.load %arg6[%c0_10, %c0_11] : memref<16x128xf32, #tpu.memory_space<vmem>>, vector<16x128xf32>
      %13 = arith.truncf %12 : vector<16x128xf32> to vector<16x128xbf16>
      %c0_12 = arith.constant 0 : index
      %c0_13 = arith.constant 0 : index
      %14 = vector.load %arg5[%c0_12, %c0_13] : memref<16x128xbf16, #tpu.memory_space<vmem>>, vector<16x128xbf16>
      tpu.vector_store %arg5[%c0_12, %c0_13], %13 {strides = array<i32>} : memref<16x128xbf16, #tpu.memory_space<vmem>>, vector<16x128xbf16>,
    } else {
    }
    return
  }
  func.func @transform_0(%arg0: i32, %arg1: i32, %arg2: i32) -> (i32, i32) {
    %c0_i32 = arith.constant 0 : i32
    return %arg0, %arg2 : i32, i32
  }
  func.func @transform_1(%arg0: i32, %arg1: i32, %arg2: i32) -> (i32, i32) {
    %c0_i32 = arith.constant 0 : i32
    return %arg2, %arg1 : i32, i32
  }
  func.func @transform_2(%arg0: i32, %arg1: i32, %arg2: i32) -> (i32, i32) {
    %c0_i32 = arith.constant 0 : i32
    return %arg0, %arg1 : i32, i32
  }
}

module attributes {stable_mosaic.version = 11 : i64} {
  func.func @_prefix_attn_kernel(%arg0: i32, %arg1: i32, %arg2: memref<1x8x128xbf16, #tpu.memory_space<vmem>>, %arg3: memref<1x8x128xbf16, #tpu.memory_space<vmem>>, %arg4: memref<1x8x128xbf16, #tpu.memory_space<vmem>>, %arg5: memref<4x4x32xbf16, #tpu.memory_space<vmem>>, %arg6: memref<4x4x32xbf16, #tpu.memory_space<vmem>>, %arg7: memref<4x8x8xbf16, #tpu.memory_space<vmem>>, %arg8: memref<1x1x8xf32, #tpu.memory_space<vmem>>, %arg9: memref<128x128xbf16, #tpu.memory_space<vmem>>, %arg10: memref<1x128xf32, #tpu.memory_space<vmem>>, %arg11: memref<1x8x128xf32, #tpu.memory_space<vmem>>, %arg12: memref<4x8x32xbf16, #tpu.memory_space<vmem>>, %arg13: memref<4x8x32xbf16, #tpu.memory_space<vmem>>) attributes {dimension_semantics = [#tpu.dimension_semantics<parallel>, #tpu.dimension_semantics<arbitrary>], iteration_bounds = array<i64: 2, 1>, scalar_prefetch = 0 : i64, scratch_operands = 2 : i64, tpu.core_type = #tpu.core_type<tc>, window_params = [{transform_indices = @transform_0, window_bounds = array<i64: 1, 8, 128>}, {transform_indices = @transform_1, window_bounds = array<i64: 1, 8, 128>}, {transform_indices = @transform_2, window_bounds = array<i64: 1, 8, 128>}, {pipeline_mode = #tpu.pipeline_mode<synchronous>, transform_indices = @transform_3, window_bounds = array<i64: 4, 4, 32>}, {pipeline_mode = #tpu.pipeline_mode<synchronous>, transform_indices = @transform_4, window_bounds = array<i64: 4, 4, 32>}, {transform_indices = @transform_5, window_bounds = array<i64: 4, 8, 8>}, {transform_indices = @transform_6, window_bounds = array<i64: 1, 1, 8>}, {pipeline_mode = #tpu.pipeline_mode<synchronous>, transform_indices = @transform_7, window_bounds = array<i64: 128, 128>}, {pipeline_mode = #tpu.pipeline_mode<synchronous>, transform_indices = @transform_8, window_bounds = array<i64: 1, 128>}, {transform_indices = @transform_9, window_bounds = array<i64: 1, 8, 128>}]} {
    %c0_i32 = arith.constant 0 : i32
    %0 = arith.cmpi eq, %arg1, %c0_i32 : i32
    %1 = arith.extui %0 : i1 to i32
    %c0_i32_0 = arith.constant 0 : i32
    %2 = arith.cmpi ne, %1, %c0_i32_0 : i32
    scf.if %2 {
      %c0_112 = arith.constant 0 : index
      %c0_113 = arith.constant 0 : index
      %c0_114 = arith.constant 0 : index
      %191 = vector.load %arg3[%c0_112, %c0_113, %c0_114] : memref<1x8x128xbf16, #tpu.memory_space<vmem>>, vector<1x8x32xbf16>
      %192 = vector.shape_cast %191 : vector<1x8x32xbf16> to vector<8x32xbf16>
      %c0_115 = arith.constant 0 : index
      %c0_116 = arith.constant 0 : index
      %c0_117 = arith.constant 0 : index
      %193 = vector.load %arg12[%c0_115, %c0_116, %c0_117] : memref<4x8x32xbf16, #tpu.memory_space<vmem>>, vector<1x8x32xbf16>
      %194 = vector.shape_cast %193 : vector<1x8x32xbf16> to vector<8x32xbf16>
      %195 = vector.shape_cast %192 : vector<8x32xbf16> to vector<1x8x32xbf16>
      tpu.vector_store %arg12[%c0_115, %c0_116, %c0_117], %195 {strides = array<i32>} : memref<4x8x32xbf16, #tpu.memory_space<vmem>>, vector<1x8x32xbf16>,
      %c0_118 = arith.constant 0 : index
      %c0_119 = arith.constant 0 : index
      %c0_120 = arith.constant 0 : index
      %196 = vector.load %arg4[%c0_118, %c0_119, %c0_120] : memref<1x8x128xbf16, #tpu.memory_space<vmem>>, vector<1x8x32xbf16>
      %197 = vector.shape_cast %196 : vector<1x8x32xbf16> to vector<8x32xbf16>
      %c0_121 = arith.constant 0 : index
      %c0_122 = arith.constant 0 : index
      %c0_123 = arith.constant 0 : index
      %198 = vector.load %arg13[%c0_121, %c0_122, %c0_123] : memref<4x8x32xbf16, #tpu.memory_space<vmem>>, vector<1x8x32xbf16>
      %199 = vector.shape_cast %198 : vector<1x8x32xbf16> to vector<8x32xbf16>
      %200 = vector.shape_cast %197 : vector<8x32xbf16> to vector<1x8x32xbf16>
      tpu.vector_store %arg13[%c0_121, %c0_122, %c0_123], %200 {strides = array<i32>} : memref<4x8x32xbf16, #tpu.memory_space<vmem>>, vector<1x8x32xbf16>,
      %c0_124 = arith.constant 0 : index
      %c0_125 = arith.constant 0 : index
      %c32_126 = arith.constant 32 : index
      %201 = vector.load %arg3[%c0_124, %c0_125, %c32_126] : memref<1x8x128xbf16, #tpu.memory_space<vmem>>, vector<1x8x32xbf16>
      %202 = vector.shape_cast %201 : vector<1x8x32xbf16> to vector<8x32xbf16>
      %c1_127 = arith.constant 1 : index
      %c0_128 = arith.constant 0 : index
      %c0_129 = arith.constant 0 : index
      %203 = vector.load %arg12[%c1_127, %c0_128, %c0_129] : memref<4x8x32xbf16, #tpu.memory_space<vmem>>, vector<1x8x32xbf16>
      %204 = vector.shape_cast %203 : vector<1x8x32xbf16> to vector<8x32xbf16>
      %205 = vector.shape_cast %202 : vector<8x32xbf16> to vector<1x8x32xbf16>
      tpu.vector_store %arg12[%c1_127, %c0_128, %c0_129], %205 {strides = array<i32>} : memref<4x8x32xbf16, #tpu.memory_space<vmem>>, vector<1x8x32xbf16>,
      %c0_130 = arith.constant 0 : index
      %c0_131 = arith.constant 0 : index
      %c32_132 = arith.constant 32 : index
      %206 = vector.load %arg4[%c0_130, %c0_131, %c32_132] : memref<1x8x128xbf16, #tpu.memory_space<vmem>>, vector<1x8x32xbf16>
      %207 = vector.shape_cast %206 : vector<1x8x32xbf16> to vector<8x32xbf16>
      %c1_133 = arith.constant 1 : index
      %c0_134 = arith.constant 0 : index
      %c0_135 = arith.constant 0 : index
      %208 = vector.load %arg13[%c1_133, %c0_134, %c0_135] : memref<4x8x32xbf16, #tpu.memory_space<vmem>>, vector<1x8x32xbf16>
      %209 = vector.shape_cast %208 : vector<1x8x32xbf16> to vector<8x32xbf16>
      %210 = vector.shape_cast %207 : vector<8x32xbf16> to vector<1x8x32xbf16>
      tpu.vector_store %arg13[%c1_133, %c0_134, %c0_135], %210 {strides = array<i32>} : memref<4x8x32xbf16, #tpu.memory_space<vmem>>, vector<1x8x32xbf16>,
      %c0_136 = arith.constant 0 : index
      %c0_137 = arith.constant 0 : index
      %c64_138 = arith.constant 64 : index
      %211 = vector.load %arg3[%c0_136, %c0_137, %c64_138] : memref<1x8x128xbf16, #tpu.memory_space<vmem>>, vector<1x8x32xbf16>
      %212 = vector.shape_cast %211 : vector<1x8x32xbf16> to vector<8x32xbf16>
      %c2_139 = arith.constant 2 : index
      %c0_140 = arith.constant 0 : index
      %c0_141 = arith.constant 0 : index
      %213 = vector.load %arg12[%c2_139, %c0_140, %c0_141] : memref<4x8x32xbf16, #tpu.memory_space<vmem>>, vector<1x8x32xbf16>
      %214 = vector.shape_cast %213 : vector<1x8x32xbf16> to vector<8x32xbf16>
      %215 = vector.shape_cast %212 : vector<8x32xbf16> to vector<1x8x32xbf16>
      tpu.vector_store %arg12[%c2_139, %c0_140, %c0_141], %215 {strides = array<i32>} : memref<4x8x32xbf16, #tpu.memory_space<vmem>>, vector<1x8x32xbf16>,
      %c0_142 = arith.constant 0 : index
      %c0_143 = arith.constant 0 : index
      %c64_144 = arith.constant 64 : index
      %216 = vector.load %arg4[%c0_142, %c0_143, %c64_144] : memref<1x8x128xbf16, #tpu.memory_space<vmem>>, vector<1x8x32xbf16>
      %217 = vector.shape_cast %216 : vector<1x8x32xbf16> to vector<8x32xbf16>
      %c2_145 = arith.constant 2 : index
      %c0_146 = arith.constant 0 : index
      %c0_147 = arith.constant 0 : index
      %218 = vector.load %arg13[%c2_145, %c0_146, %c0_147] : memref<4x8x32xbf16, #tpu.memory_space<vmem>>, vector<1x8x32xbf16>
      %219 = vector.shape_cast %218 : vector<1x8x32xbf16> to vector<8x32xbf16>
      %220 = vector.shape_cast %217 : vector<8x32xbf16> to vector<1x8x32xbf16>
      tpu.vector_store %arg13[%c2_145, %c0_146, %c0_147], %220 {strides = array<i32>} : memref<4x8x32xbf16, #tpu.memory_space<vmem>>, vector<1x8x32xbf16>,
      %c0_148 = arith.constant 0 : index
      %c0_149 = arith.constant 0 : index
      %c96_150 = arith.constant 96 : index
      %221 = vector.load %arg3[%c0_148, %c0_149, %c96_150] : memref<1x8x128xbf16, #tpu.memory_space<vmem>>, vector<1x8x32xbf16>
      %222 = vector.shape_cast %221 : vector<1x8x32xbf16> to vector<8x32xbf16>
      %c3_151 = arith.constant 3 : index
      %c0_152 = arith.constant 0 : index
      %c0_153 = arith.constant 0 : index
      %223 = vector.load %arg12[%c3_151, %c0_152, %c0_153] : memref<4x8x32xbf16, #tpu.memory_space<vmem>>, vector<1x8x32xbf16>
      %224 = vector.shape_cast %223 : vector<1x8x32xbf16> to vector<8x32xbf16>
      %225 = vector.shape_cast %222 : vector<8x32xbf16> to vector<1x8x32xbf16>
      tpu.vector_store %arg12[%c3_151, %c0_152, %c0_153], %225 {strides = array<i32>} : memref<4x8x32xbf16, #tpu.memory_space<vmem>>, vector<1x8x32xbf16>,
      %c0_154 = arith.constant 0 : index
      %c0_155 = arith.constant 0 : index
      %c96_156 = arith.constant 96 : index
      %226 = vector.load %arg4[%c0_154, %c0_155, %c96_156] : memref<1x8x128xbf16, #tpu.memory_space<vmem>>, vector<1x8x32xbf16>
      %227 = vector.shape_cast %226 : vector<1x8x32xbf16> to vector<8x32xbf16>
      %c3_157 = arith.constant 3 : index
      %c0_158 = arith.constant 0 : index
      %c0_159 = arith.constant 0 : index
      %228 = vector.load %arg13[%c3_157, %c0_158, %c0_159] : memref<4x8x32xbf16, #tpu.memory_space<vmem>>, vector<1x8x32xbf16>
      %229 = vector.shape_cast %228 : vector<1x8x32xbf16> to vector<8x32xbf16>
      %230 = vector.shape_cast %227 : vector<8x32xbf16> to vector<1x8x32xbf16>
      tpu.vector_store %arg13[%c3_157, %c0_158, %c0_159], %230 {strides = array<i32>} : memref<4x8x32xbf16, #tpu.memory_space<vmem>>, vector<1x8x32xbf16>,
    } else {
    }
    %c0 = arith.constant 0 : index
    %c0_1 = arith.constant 0 : index
    %c0_2 = arith.constant 0 : index
    %3 = vector.load %arg8[%c0, %c0_1, %c0_2] : memref<1x1x8xf32, #tpu.memory_space<vmem>>, vector<1x1x8xf32>
    %4 = vector.shape_cast %3 : vector<1x1x8xf32> to vector<1x8xf32>
    %c0_3 = arith.constant 0 : index
    %c0_4 = arith.constant 0 : index
    %c0_5 = arith.constant 0 : index
    %5 = vector.load %arg2[%c0_3, %c0_4, %c0_5] : memref<1x8x128xbf16, #tpu.memory_space<vmem>>, vector<1x8x32xbf16>
    %6 = vector.shape_cast %5 : vector<1x8x32xbf16> to vector<8x32xbf16>
    %cst = arith.constant 1.767580e-01 : bf16
    %7 = vector.broadcast %cst : bf16 to vector<8x32xbf16>
    %8 = arith.mulf %6, %7 : vector<8x32xbf16>
    %c0_6 = arith.constant 0 : index
    %c0_7 = arith.constant 0 : index
    %c0_8 = arith.constant 0 : index
    %9 = vector.load %arg12[%c0_6, %c0_7, %c0_8] : memref<4x8x32xbf16, #tpu.memory_space<vmem>>, vector<1x8x32xbf16>
    %10 = vector.shape_cast %9 : vector<1x8x32xbf16> to vector<8x32xbf16>
    %c0_9 = arith.constant 0 : index
    %c0_10 = arith.constant 0 : index
    %c0_11 = arith.constant 0 : index
    %11 = vector.load %arg13[%c0_9, %c0_10, %c0_11] : memref<4x8x32xbf16, #tpu.memory_space<vmem>>, vector<1x8x32xbf16>
    %12 = vector.shape_cast %11 : vector<1x8x32xbf16> to vector<8x32xbf16>
    %cst_12 = arith.constant dense<0.000000e+00> : vector<8x8xf32>
    %13 = tpu.matmul %8, %10, %cst_12 {dimension_numbers = #tpu.dot_dimension_numbers<[1], [1], [0], [0], [0, 0, 1, 0], [], []>} : vector<8x32xbf16>, vector<8x32xbf16>, vector<8x8xf32> -> vector<8x8xf32>
    %14 = vector.broadcast %4 : vector<1x8xf32> to vector<8x8xf32>
    %15 = arith.addf %13, %14 : vector<8x8xf32>
    %c0_13 = arith.constant 0 : index
    %c0_14 = arith.constant 0 : index
    %c0_15 = arith.constant 0 : index
    %16 = vector.load %arg7[%c0_13, %c0_14, %c0_15] : memref<4x8x8xbf16, #tpu.memory_space<vmem>>, vector<1x8x8xbf16>
    %17 = vector.shape_cast %16 : vector<1x8x8xbf16> to vector<8x8xbf16>
    %18 = arith.extf %17 : vector<8x8xbf16> to vector<8x8xf32>
    %19 = arith.addf %15, %18 : vector<8x8xf32>
    %c0_16 = arith.constant 0 : index
    %c0_17 = arith.constant 0 : index
    %c0_18 = arith.constant 0 : index
    %20 = vector.load %arg5[%c0_16, %c0_17, %c0_18] : memref<4x4x32xbf16, #tpu.memory_space<vmem>>, vector<1x4x32xbf16>
    %21 = vector.shape_cast %20 : vector<1x4x32xbf16> to vector<4x32xbf16>
    %cst_19 = arith.constant dense<0.000000e+00> : vector<8x4xf32>
    %22 = tpu.matmul %8, %21, %cst_19 {dimension_numbers = #tpu.dot_dimension_numbers<[1], [1], [0], [0], [0, 0, 1, 0], [], []>} : vector<8x32xbf16>, vector<4x32xbf16>, vector<8x4xf32> -> vector<8x4xf32>
    %cst_20 = arith.constant dense<0xFF800000> : vector<8xf32>
    %23 = vector.multi_reduction <maximumf>, %19, %cst_20 [1] : vector<8x8xf32> to vector<8xf32>
    %24 = vector.shape_cast %23 : vector<8xf32> to vector<8x1xf32>
    %cst_21 = arith.constant dense<0xFF800000> : vector<8xf32>
    %25 = vector.multi_reduction <maximumf>, %22, %cst_21 [1] : vector<8x4xf32> to vector<8xf32>
    %26 = vector.shape_cast %25 : vector<8xf32> to vector<8x1xf32>
    %27 = arith.maximumf %24, %26 : vector<8x1xf32>
    %28 = vector.broadcast %27 : vector<8x1xf32> to vector<8x8xf32>
    %29 = arith.subf %19, %28 : vector<8x8xf32>
    %30 = math.exp %29 : vector<8x8xf32>
    %31 = vector.broadcast %27 : vector<8x1xf32> to vector<8x4xf32>
    %32 = arith.subf %22, %31 : vector<8x4xf32>
    %33 = math.exp %32 : vector<8x4xf32>
    %cst_22 = arith.constant dense<0.000000e+00> : vector<8xf32>
    %34 = vector.multi_reduction <add>, %30, %cst_22 [1] : vector<8x8xf32> to vector<8xf32>
    %35 = vector.shape_cast %34 : vector<8xf32> to vector<8x1xf32>
    %cst_23 = arith.constant dense<0.000000e+00> : vector<8xf32>
    %36 = vector.multi_reduction <add>, %33, %cst_23 [1] : vector<8x4xf32> to vector<8xf32>
    %37 = vector.shape_cast %36 : vector<8xf32> to vector<8x1xf32>
    %38 = arith.addf %35, %37 : vector<8x1xf32>
    %39 = arith.truncf %33 : vector<8x4xf32> to vector<8x4xbf16>
    %c0_24 = arith.constant 0 : index
    %c0_25 = arith.constant 0 : index
    %c0_26 = arith.constant 0 : index
    %40 = vector.load %arg6[%c0_24, %c0_25, %c0_26] : memref<4x4x32xbf16, #tpu.memory_space<vmem>>, vector<1x4x32xbf16>
    %41 = vector.shape_cast %40 : vector<1x4x32xbf16> to vector<4x32xbf16>
    %cst_27 = arith.constant dense<0.000000e+00> : vector<8x32xf32>
    %42 = tpu.matmul %39, %41, %cst_27 {dimension_numbers = #tpu.dot_dimension_numbers<[1], [0], [0], [1], [0, 0, 1, 1], [], []>} : vector<8x4xbf16>, vector<4x32xbf16>, vector<8x32xf32> -> vector<8x32xf32>
    %43 = arith.truncf %30 : vector<8x8xf32> to vector<8x8xbf16>
    %cst_28 = arith.constant dense<0.000000e+00> : vector<8x32xf32>
    %44 = tpu.matmul %43, %12, %cst_28 {dimension_numbers = #tpu.dot_dimension_numbers<[1], [0], [0], [1], [0, 0, 1, 1], [], []>} : vector<8x8xbf16>, vector<8x32xbf16>, vector<8x32xf32> -> vector<8x32xf32>
    %45 = arith.addf %42, %44 : vector<8x32xf32>
    %46 = tpu.reciprocal %38 {approx = true} : vector<8x1xf32> -> vector<8x1xf32>
    %47 = vector.broadcast %46 : vector<8x1xf32> to vector<8x32xf32>
    %48 = arith.mulf %45, %47 : vector<8x32xf32>
    %c0_29 = arith.constant 0 : index
    %c0_30 = arith.constant 0 : index
    %c32 = arith.constant 32 : index
    %49 = vector.load %arg2[%c0_29, %c0_30, %c32] : memref<1x8x128xbf16, #tpu.memory_space<vmem>>, vector<1x8x32xbf16>
    %50 = vector.shape_cast %49 : vector<1x8x32xbf16> to vector<8x32xbf16>
    %cst_31 = arith.constant 1.767580e-01 : bf16
    %51 = vector.broadcast %cst_31 : bf16 to vector<8x32xbf16>
    %52 = arith.mulf %50, %51 : vector<8x32xbf16>
    %c1 = arith.constant 1 : index
    %c0_32 = arith.constant 0 : index
    %c0_33 = arith.constant 0 : index
    %53 = vector.load %arg12[%c1, %c0_32, %c0_33] : memref<4x8x32xbf16, #tpu.memory_space<vmem>>, vector<1x8x32xbf16>
    %54 = vector.shape_cast %53 : vector<1x8x32xbf16> to vector<8x32xbf16>
    %c1_34 = arith.constant 1 : index
    %c0_35 = arith.constant 0 : index
    %c0_36 = arith.constant 0 : index
    %55 = vector.load %arg13[%c1_34, %c0_35, %c0_36] : memref<4x8x32xbf16, #tpu.memory_space<vmem>>, vector<1x8x32xbf16>
    %56 = vector.shape_cast %55 : vector<1x8x32xbf16> to vector<8x32xbf16>
    %cst_37 = arith.constant dense<0.000000e+00> : vector<8x8xf32>
    %57 = tpu.matmul %52, %54, %cst_37 {dimension_numbers = #tpu.dot_dimension_numbers<[1], [1], [0], [0], [0, 0, 1, 0], [], []>} : vector<8x32xbf16>, vector<8x32xbf16>, vector<8x8xf32> -> vector<8x8xf32>
    %58 = vector.broadcast %4 : vector<1x8xf32> to vector<8x8xf32>
    %59 = arith.addf %57, %58 : vector<8x8xf32>
    %c1_38 = arith.constant 1 : index
    %c0_39 = arith.constant 0 : index
    %c0_40 = arith.constant 0 : index
    %60 = vector.load %arg7[%c1_38, %c0_39, %c0_40] : memref<4x8x8xbf16, #tpu.memory_space<vmem>>, vector<1x8x8xbf16>
    %61 = vector.shape_cast %60 : vector<1x8x8xbf16> to vector<8x8xbf16>
    %62 = arith.extf %61 : vector<8x8xbf16> to vector<8x8xf32>
    %63 = arith.addf %59, %62 : vector<8x8xf32>
    %c1_41 = arith.constant 1 : index
    %c0_42 = arith.constant 0 : index
    %c0_43 = arith.constant 0 : index
    %64 = vector.load %arg5[%c1_41, %c0_42, %c0_43] : memref<4x4x32xbf16, #tpu.memory_space<vmem>>, vector<1x4x32xbf16>
    %65 = vector.shape_cast %64 : vector<1x4x32xbf16> to vector<4x32xbf16>
    %cst_44 = arith.constant dense<0.000000e+00> : vector<8x4xf32>
    %66 = tpu.matmul %52, %65, %cst_44 {dimension_numbers = #tpu.dot_dimension_numbers<[1], [1], [0], [0], [0, 0, 1, 0], [], []>} : vector<8x32xbf16>, vector<4x32xbf16>, vector<8x4xf32> -> vector<8x4xf32>
    %cst_45 = arith.constant dense<0xFF800000> : vector<8xf32>
    %67 = vector.multi_reduction <maximumf>, %63, %cst_45 [1] : vector<8x8xf32> to vector<8xf32>
    %68 = vector.shape_cast %67 : vector<8xf32> to vector<8x1xf32>
    %cst_46 = arith.constant dense<0xFF800000> : vector<8xf32>
    %69 = vector.multi_reduction <maximumf>, %66, %cst_46 [1] : vector<8x4xf32> to vector<8xf32>
    %70 = vector.shape_cast %69 : vector<8xf32> to vector<8x1xf32>
    %71 = arith.maximumf %68, %70 : vector<8x1xf32>
    %72 = vector.broadcast %71 : vector<8x1xf32> to vector<8x8xf32>
    %73 = arith.subf %63, %72 : vector<8x8xf32>
    %74 = math.exp %73 : vector<8x8xf32>
    %75 = vector.broadcast %71 : vector<8x1xf32> to vector<8x4xf32>
    %76 = arith.subf %66, %75 : vector<8x4xf32>
    %77 = math.exp %76 : vector<8x4xf32>
    %cst_47 = arith.constant dense<0.000000e+00> : vector<8xf32>
    %78 = vector.multi_reduction <add>, %74, %cst_47 [1] : vector<8x8xf32> to vector<8xf32>
    %79 = vector.shape_cast %78 : vector<8xf32> to vector<8x1xf32>
    %cst_48 = arith.constant dense<0.000000e+00> : vector<8xf32>
    %80 = vector.multi_reduction <add>, %77, %cst_48 [1] : vector<8x4xf32> to vector<8xf32>
    %81 = vector.shape_cast %80 : vector<8xf32> to vector<8x1xf32>
    %82 = arith.addf %79, %81 : vector<8x1xf32>
    %83 = arith.truncf %77 : vector<8x4xf32> to vector<8x4xbf16>
    %c1_49 = arith.constant 1 : index
    %c0_50 = arith.constant 0 : index
    %c0_51 = arith.constant 0 : index
    %84 = vector.load %arg6[%c1_49, %c0_50, %c0_51] : memref<4x4x32xbf16, #tpu.memory_space<vmem>>, vector<1x4x32xbf16>
    %85 = vector.shape_cast %84 : vector<1x4x32xbf16> to vector<4x32xbf16>
    %cst_52 = arith.constant dense<0.000000e+00> : vector<8x32xf32>
    %86 = tpu.matmul %83, %85, %cst_52 {dimension_numbers = #tpu.dot_dimension_numbers<[1], [0], [0], [1], [0, 0, 1, 1], [], []>} : vector<8x4xbf16>, vector<4x32xbf16>, vector<8x32xf32> -> vector<8x32xf32>
    %87 = arith.truncf %74 : vector<8x8xf32> to vector<8x8xbf16>
    %cst_53 = arith.constant dense<0.000000e+00> : vector<8x32xf32>
    %88 = tpu.matmul %87, %56, %cst_53 {dimension_numbers = #tpu.dot_dimension_numbers<[1], [0], [0], [1], [0, 0, 1, 1], [], []>} : vector<8x8xbf16>, vector<8x32xbf16>, vector<8x32xf32> -> vector<8x32xf32>
    %89 = arith.addf %86, %88 : vector<8x32xf32>
    %90 = tpu.reciprocal %82 {approx = true} : vector<8x1xf32> -> vector<8x1xf32>
    %91 = vector.broadcast %90 : vector<8x1xf32> to vector<8x32xf32>
    %92 = arith.mulf %89, %91 : vector<8x32xf32>
    %c0_54 = arith.constant 0 : index
    %c0_55 = arith.constant 0 : index
    %c64 = arith.constant 64 : index
    %93 = vector.load %arg2[%c0_54, %c0_55, %c64] : memref<1x8x128xbf16, #tpu.memory_space<vmem>>, vector<1x8x32xbf16>
    %94 = vector.shape_cast %93 : vector<1x8x32xbf16> to vector<8x32xbf16>
    %cst_56 = arith.constant 1.767580e-01 : bf16
    %95 = vector.broadcast %cst_56 : bf16 to vector<8x32xbf16>
    %96 = arith.mulf %94, %95 : vector<8x32xbf16>
    %c2 = arith.constant 2 : index
    %c0_57 = arith.constant 0 : index
    %c0_58 = arith.constant 0 : index
    %97 = vector.load %arg12[%c2, %c0_57, %c0_58] : memref<4x8x32xbf16, #tpu.memory_space<vmem>>, vector<1x8x32xbf16>
    %98 = vector.shape_cast %97 : vector<1x8x32xbf16> to vector<8x32xbf16>
    %c2_59 = arith.constant 2 : index
    %c0_60 = arith.constant 0 : index
    %c0_61 = arith.constant 0 : index
    %99 = vector.load %arg13[%c2_59, %c0_60, %c0_61] : memref<4x8x32xbf16, #tpu.memory_space<vmem>>, vector<1x8x32xbf16>
    %100 = vector.shape_cast %99 : vector<1x8x32xbf16> to vector<8x32xbf16>
    %cst_62 = arith.constant dense<0.000000e+00> : vector<8x8xf32>
    %101 = tpu.matmul %96, %98, %cst_62 {dimension_numbers = #tpu.dot_dimension_numbers<[1], [1], [0], [0], [0, 0, 1, 0], [], []>} : vector<8x32xbf16>, vector<8x32xbf16>, vector<8x8xf32> -> vector<8x8xf32>
    %102 = vector.broadcast %4 : vector<1x8xf32> to vector<8x8xf32>
    %103 = arith.addf %101, %102 : vector<8x8xf32>
    %c2_63 = arith.constant 2 : index
    %c0_64 = arith.constant 0 : index
    %c0_65 = arith.constant 0 : index
    %104 = vector.load %arg7[%c2_63, %c0_64, %c0_65] : memref<4x8x8xbf16, #tpu.memory_space<vmem>>, vector<1x8x8xbf16>
    %105 = vector.shape_cast %104 : vector<1x8x8xbf16> to vector<8x8xbf16>
    %106 = arith.extf %105 : vector<8x8xbf16> to vector<8x8xf32>
    %107 = arith.addf %103, %106 : vector<8x8xf32>
    %c2_66 = arith.constant 2 : index
    %c0_67 = arith.constant 0 : index
    %c0_68 = arith.constant 0 : index
    %108 = vector.load %arg5[%c2_66, %c0_67, %c0_68] : memref<4x4x32xbf16, #tpu.memory_space<vmem>>, vector<1x4x32xbf16>
    %109 = vector.shape_cast %108 : vector<1x4x32xbf16> to vector<4x32xbf16>
    %cst_69 = arith.constant dense<0.000000e+00> : vector<8x4xf32>
    %110 = tpu.matmul %96, %109, %cst_69 {dimension_numbers = #tpu.dot_dimension_numbers<[1], [1], [0], [0], [0, 0, 1, 0], [], []>} : vector<8x32xbf16>, vector<4x32xbf16>, vector<8x4xf32> -> vector<8x4xf32>
    %cst_70 = arith.constant dense<0xFF800000> : vector<8xf32>
    %111 = vector.multi_reduction <maximumf>, %107, %cst_70 [1] : vector<8x8xf32> to vector<8xf32>
    %112 = vector.shape_cast %111 : vector<8xf32> to vector<8x1xf32>
    %cst_71 = arith.constant dense<0xFF800000> : vector<8xf32>
    %113 = vector.multi_reduction <maximumf>, %110, %cst_71 [1] : vector<8x4xf32> to vector<8xf32>
    %114 = vector.shape_cast %113 : vector<8xf32> to vector<8x1xf32>
    %115 = arith.maximumf %112, %114 : vector<8x1xf32>
    %116 = vector.broadcast %115 : vector<8x1xf32> to vector<8x8xf32>
    %117 = arith.subf %107, %116 : vector<8x8xf32>
    %118 = math.exp %117 : vector<8x8xf32>
    %119 = vector.broadcast %115 : vector<8x1xf32> to vector<8x4xf32>
    %120 = arith.subf %110, %119 : vector<8x4xf32>
    %121 = math.exp %120 : vector<8x4xf32>
    %cst_72 = arith.constant dense<0.000000e+00> : vector<8xf32>
    %122 = vector.multi_reduction <add>, %118, %cst_72 [1] : vector<8x8xf32> to vector<8xf32>
    %123 = vector.shape_cast %122 : vector<8xf32> to vector<8x1xf32>
    %cst_73 = arith.constant dense<0.000000e+00> : vector<8xf32>
    %124 = vector.multi_reduction <add>, %121, %cst_73 [1] : vector<8x4xf32> to vector<8xf32>
    %125 = vector.shape_cast %124 : vector<8xf32> to vector<8x1xf32>
    %126 = arith.addf %123, %125 : vector<8x1xf32>
    %127 = arith.truncf %121 : vector<8x4xf32> to vector<8x4xbf16>
    %c2_74 = arith.constant 2 : index
    %c0_75 = arith.constant 0 : index
    %c0_76 = arith.constant 0 : index
    %128 = vector.load %arg6[%c2_74, %c0_75, %c0_76] : memref<4x4x32xbf16, #tpu.memory_space<vmem>>, vector<1x4x32xbf16>
    %129 = vector.shape_cast %128 : vector<1x4x32xbf16> to vector<4x32xbf16>
    %cst_77 = arith.constant dense<0.000000e+00> : vector<8x32xf32>
    %130 = tpu.matmul %127, %129, %cst_77 {dimension_numbers = #tpu.dot_dimension_numbers<[1], [0], [0], [1], [0, 0, 1, 1], [], []>} : vector<8x4xbf16>, vector<4x32xbf16>, vector<8x32xf32> -> vector<8x32xf32>
    %131 = arith.truncf %118 : vector<8x8xf32> to vector<8x8xbf16>
    %cst_78 = arith.constant dense<0.000000e+00> : vector<8x32xf32>
    %132 = tpu.matmul %131, %100, %cst_78 {dimension_numbers = #tpu.dot_dimension_numbers<[1], [0], [0], [1], [0, 0, 1, 1], [], []>} : vector<8x8xbf16>, vector<8x32xbf16>, vector<8x32xf32> -> vector<8x32xf32>
    %133 = arith.addf %130, %132 : vector<8x32xf32>
    %134 = tpu.reciprocal %126 {approx = true} : vector<8x1xf32> -> vector<8x1xf32>
    %135 = vector.broadcast %134 : vector<8x1xf32> to vector<8x32xf32>
    %136 = arith.mulf %133, %135 : vector<8x32xf32>
    %c0_79 = arith.constant 0 : index
    %c0_80 = arith.constant 0 : index
    %c96 = arith.constant 96 : index
    %137 = vector.load %arg2[%c0_79, %c0_80, %c96] : memref<1x8x128xbf16, #tpu.memory_space<vmem>>, vector<1x8x32xbf16>
    %138 = vector.shape_cast %137 : vector<1x8x32xbf16> to vector<8x32xbf16>
    %cst_81 = arith.constant 1.767580e-01 : bf16
    %139 = vector.broadcast %cst_81 : bf16 to vector<8x32xbf16>
    %140 = arith.mulf %138, %139 : vector<8x32xbf16>
    %c3 = arith.constant 3 : index
    %c0_82 = arith.constant 0 : index
    %c0_83 = arith.constant 0 : index
    %141 = vector.load %arg12[%c3, %c0_82, %c0_83] : memref<4x8x32xbf16, #tpu.memory_space<vmem>>, vector<1x8x32xbf16>
    %142 = vector.shape_cast %141 : vector<1x8x32xbf16> to vector<8x32xbf16>
    %c3_84 = arith.constant 3 : index
    %c0_85 = arith.constant 0 : index
    %c0_86 = arith.constant 0 : index
    %143 = vector.load %arg13[%c3_84, %c0_85, %c0_86] : memref<4x8x32xbf16, #tpu.memory_space<vmem>>, vector<1x8x32xbf16>
    %144 = vector.shape_cast %143 : vector<1x8x32xbf16> to vector<8x32xbf16>
    %cst_87 = arith.constant dense<0.000000e+00> : vector<8x8xf32>
    %145 = tpu.matmul %140, %142, %cst_87 {dimension_numbers = #tpu.dot_dimension_numbers<[1], [1], [0], [0], [0, 0, 1, 0], [], []>} : vector<8x32xbf16>, vector<8x32xbf16>, vector<8x8xf32> -> vector<8x8xf32>
    %146 = vector.broadcast %4 : vector<1x8xf32> to vector<8x8xf32>
    %147 = arith.addf %145, %146 : vector<8x8xf32>
    %c3_88 = arith.constant 3 : index
    %c0_89 = arith.constant 0 : index
    %c0_90 = arith.constant 0 : index
    %148 = vector.load %arg7[%c3_88, %c0_89, %c0_90] : memref<4x8x8xbf16, #tpu.memory_space<vmem>>, vector<1x8x8xbf16>
    %149 = vector.shape_cast %148 : vector<1x8x8xbf16> to vector<8x8xbf16>
    %150 = arith.extf %149 : vector<8x8xbf16> to vector<8x8xf32>
    %151 = arith.addf %147, %150 : vector<8x8xf32>
    %c3_91 = arith.constant 3 : index
    %c0_92 = arith.constant 0 : index
    %c0_93 = arith.constant 0 : index
    %152 = vector.load %arg5[%c3_91, %c0_92, %c0_93] : memref<4x4x32xbf16, #tpu.memory_space<vmem>>, vector<1x4x32xbf16>
    %153 = vector.shape_cast %152 : vector<1x4x32xbf16> to vector<4x32xbf16>
    %cst_94 = arith.constant dense<0.000000e+00> : vector<8x4xf32>
    %154 = tpu.matmul %140, %153, %cst_94 {dimension_numbers = #tpu.dot_dimension_numbers<[1], [1], [0], [0], [0, 0, 1, 0], [], []>} : vector<8x32xbf16>, vector<4x32xbf16>, vector<8x4xf32> -> vector<8x4xf32>
    %cst_95 = arith.constant dense<0xFF800000> : vector<8xf32>
    %155 = vector.multi_reduction <maximumf>, %151, %cst_95 [1] : vector<8x8xf32> to vector<8xf32>
    %156 = vector.shape_cast %155 : vector<8xf32> to vector<8x1xf32>
    %cst_96 = arith.constant dense<0xFF800000> : vector<8xf32>
    %157 = vector.multi_reduction <maximumf>, %154, %cst_96 [1] : vector<8x4xf32> to vector<8xf32>
    %158 = vector.shape_cast %157 : vector<8xf32> to vector<8x1xf32>
    %159 = arith.maximumf %156, %158 : vector<8x1xf32>
    %160 = vector.broadcast %159 : vector<8x1xf32> to vector<8x8xf32>
    %161 = arith.subf %151, %160 : vector<8x8xf32>
    %162 = math.exp %161 : vector<8x8xf32>
    %163 = vector.broadcast %159 : vector<8x1xf32> to vector<8x4xf32>
    %164 = arith.subf %154, %163 : vector<8x4xf32>
    %165 = math.exp %164 : vector<8x4xf32>
    %cst_97 = arith.constant dense<0.000000e+00> : vector<8xf32>
    %166 = vector.multi_reduction <add>, %162, %cst_97 [1] : vector<8x8xf32> to vector<8xf32>
    %167 = vector.shape_cast %166 : vector<8xf32> to vector<8x1xf32>
    %cst_98 = arith.constant dense<0.000000e+00> : vector<8xf32>
    %168 = vector.multi_reduction <add>, %165, %cst_98 [1] : vector<8x4xf32> to vector<8xf32>
    %169 = vector.shape_cast %168 : vector<8xf32> to vector<8x1xf32>
    %170 = arith.addf %167, %169 : vector<8x1xf32>
    %171 = arith.truncf %165 : vector<8x4xf32> to vector<8x4xbf16>
    %c3_99 = arith.constant 3 : index
    %c0_100 = arith.constant 0 : index
    %c0_101 = arith.constant 0 : index
    %172 = vector.load %arg6[%c3_99, %c0_100, %c0_101] : memref<4x4x32xbf16, #tpu.memory_space<vmem>>, vector<1x4x32xbf16>
    %173 = vector.shape_cast %172 : vector<1x4x32xbf16> to vector<4x32xbf16>
    %cst_102 = arith.constant dense<0.000000e+00> : vector<8x32xf32>
    %174 = tpu.matmul %171, %173, %cst_102 {dimension_numbers = #tpu.dot_dimension_numbers<[1], [0], [0], [1], [0, 0, 1, 1], [], []>} : vector<8x4xbf16>, vector<4x32xbf16>, vector<8x32xf32> -> vector<8x32xf32>
    %175 = arith.truncf %162 : vector<8x8xf32> to vector<8x8xbf16>
    %cst_103 = arith.constant dense<0.000000e+00> : vector<8x32xf32>
    %176 = tpu.matmul %175, %144, %cst_103 {dimension_numbers = #tpu.dot_dimension_numbers<[1], [0], [0], [1], [0, 0, 1, 1], [], []>} : vector<8x8xbf16>, vector<8x32xbf16>, vector<8x32xf32> -> vector<8x32xf32>
    %177 = arith.addf %174, %176 : vector<8x32xf32>
    %178 = tpu.reciprocal %170 {approx = true} : vector<8x1xf32> -> vector<8x1xf32>
    %179 = vector.broadcast %178 : vector<8x1xf32> to vector<8x32xf32>
    %180 = arith.mulf %177, %179 : vector<8x32xf32>
    %181 = tpu.concatenate %48, %92, %136, %180 in 1 : vector<8x32xf32>, vector<8x32xf32>, vector<8x32xf32>, vector<8x32xf32> -> vector<8x128xf32>
    %182 = arith.truncf %181 : vector<8x128xf32> to vector<8x128xbf16>
    %c0_104 = arith.constant 0 : index
    %c0_105 = arith.constant 0 : index
    %183 = vector.load %arg9[%c0_104, %c0_105] : memref<128x128xbf16, #tpu.memory_space<vmem>>, vector<128x128xbf16>
    %cst_106 = arith.constant dense<0.000000e+00> : vector<8x128xf32>
    %184 = tpu.matmul %182, %183, %cst_106 {dimension_numbers = #tpu.dot_dimension_numbers<[1], [0], [0], [1], [0, 0, 1, 1], [], []>} : vector<8x128xbf16>, vector<128x128xbf16>, vector<8x128xf32> -> vector<8x128xf32>
    %c0_107 = arith.constant 0 : index
    %c0_108 = arith.constant 0 : index
    %185 = vector.load %arg10[%c0_107, %c0_108] : memref<1x128xf32, #tpu.memory_space<vmem>>, vector<1x128xf32>
    %186 = vector.broadcast %185 : vector<1x128xf32> to vector<8x128xf32>
    %187 = arith.addf %184, %186 : vector<8x128xf32>
    %c0_109 = arith.constant 0 : index
    %c0_110 = arith.constant 0 : index
    %c0_111 = arith.constant 0 : index
    %188 = vector.load %arg11[%c0_109, %c0_110, %c0_111] : memref<1x8x128xf32, #tpu.memory_space<vmem>>, vector<1x8x128xf32>
    %189 = vector.shape_cast %188 : vector<1x8x128xf32> to vector<8x128xf32>
    %190 = vector.shape_cast %187 : vector<8x128xf32> to vector<1x8x128xf32>
    tpu.vector_store %arg11[%c0_109, %c0_110, %c0_111], %190 {strides = array<i32>} : memref<1x8x128xf32, #tpu.memory_space<vmem>>, vector<1x8x128xf32>,
    return
  }
  func.func @transform_0(%arg0: i32, %arg1: i32) -> (i32, i32, i32) {
    %c0_i32 = arith.constant 0 : i32
    %c0_i32_0 = arith.constant 0 : i32
    return %arg0, %arg1, %c0_i32 : i32, i32, i32
  }
  func.func @transform_1(%arg0: i32, %arg1: i32) -> (i32, i32, i32) {
    %c0_i32 = arith.constant 0 : i32
    %c1_i32 = arith.constant 1 : i32
    %c0_i32_0 = arith.constant 0 : i32
    return %arg0, %c0_i32, %c1_i32 : i32, i32, i32
  }
  func.func @transform_2(%arg0: i32, %arg1: i32) -> (i32, i32, i32) {
    %c0_i32 = arith.constant 0 : i32
    %c2_i32 = arith.constant 2 : i32
    %c0_i32_0 = arith.constant 0 : i32
    return %arg0, %c0_i32, %c2_i32 : i32, i32, i32
  }
  func.func @transform_3(%arg0: i32, %arg1: i32) -> (i32, i32, i32) {
    %c0_i32 = arith.constant 0 : i32
    %c0_i32_0 = arith.constant 0 : i32
    %c0_i32_1 = arith.constant 0 : i32
    %c0_i32_2 = arith.constant 0 : i32
    return %c0_i32, %c0_i32_0, %c0_i32_1 : i32, i32, i32
  }
  func.func @transform_4(%arg0: i32, %arg1: i32) -> (i32, i32, i32) {
    %c0_i32 = arith.constant 0 : i32
    %c0_i32_0 = arith.constant 0 : i32
    %c0_i32_1 = arith.constant 0 : i32
    %c0_i32_2 = arith.constant 0 : i32
    return %c0_i32, %c0_i32_0, %c0_i32_1 : i32, i32, i32
  }
  func.func @transform_5(%arg0: i32, %arg1: i32) -> (i32, i32, i32) {
    %c0_i32 = arith.constant 0 : i32
    %c0_i32_0 = arith.constant 0 : i32
    %c0_i32_1 = arith.constant 0 : i32
    return %c0_i32, %arg1, %c0_i32_0 : i32, i32, i32
  }
  func.func @transform_6(%arg0: i32, %arg1: i32) -> (i32, i32, i32) {
    %c0_i32 = arith.constant 0 : i32
    %c0_i32_0 = arith.constant 0 : i32
    %c0_i32_1 = arith.constant 0 : i32
    return %arg0, %c0_i32, %c0_i32_0 : i32, i32, i32
  }
  func.func @transform_7(%arg0: i32, %arg1: i32) -> (i32, i32) {
    %c0_i32 = arith.constant 0 : i32
    %c0_i32_0 = arith.constant 0 : i32
    %c0_i32_1 = arith.constant 0 : i32
    return %c0_i32, %c0_i32_0 : i32, i32
  }
  func.func @transform_8(%arg0: i32, %arg1: i32) -> (i32, i32) {
    %c0_i32 = arith.constant 0 : i32
    %c0_i32_0 = arith.constant 0 : i32
    %c0_i32_1 = arith.constant 0 : i32
    return %c0_i32, %c0_i32_0 : i32, i32
  }
  func.func @transform_9(%arg0: i32, %arg1: i32) -> (i32, i32, i32) {
    %c0_i32 = arith.constant 0 : i32
    %c0_i32_0 = arith.constant 0 : i32
    return %arg0, %arg1, %c0_i32 : i32, i32, i32
  }
}

</mosaic_0001>

<bundles_post_ra>
// kernel: moe_prefix_attention_forward.2
= control target key start
LH: loop header
LB: loop body
LE: loop exit
PB: predicated region body
PF: predicated region fallthrough
CT: control target
= control target key end

     0   :  { %s715_s9 = smov 0   ;;  %s717_s10 = smov 0   ;;  %s808_s0 = inlined_call_operand.vmem [shape: bf16[16,128], index: 0, kind: input, shape index: {}]   ;;  %s809_s1 = inlined_call_operand.vmem [shape: bf16[128,384], index: 1, kind: input, shape index: {}]   ;;  %s810_s2 = inlined_call_operand.vmem [shape: bf16[16,384], index: 2, kind: output, shape index: {}]  }
   0x1   :  { %s719_s11 = smov 0   ;;  %s721_s12 = smov 0  }
   0x2   :  { %s723_s13 = smov 0  }
   0x3 LB: > { %s27_s14 = sadd.s32 1, %s694_s12  ;;  %s556_s15 = sadd.s32 4294967295, %s698_s13   ;;  %s698_s13 = sphi %s723_s13, %s12_s13   ;;  %s694_s12 = sphi %s721_s12, %s815_s12   ;;  %s690_s11 = sphi %s719_s11, %s814_s11   ;;  %s686_s10 = sphi %s717_s10, %s813_s10   ;;  %s682_s9 = sphi %s715_s9, %s812_s9  }
   0x4   : > { %p29_p0 = scmp.ge.s32.totalorder %s27_s14, 3  ;;  %p75_p1 = scmp.ne.s32.totalorder %s686_s10, %s682_s9 }
   0x5   : > { %p76_p2 = scmp.eq.s32.totalorder %s698_s13, 0  ;;  %p107_p4 = scmp.eq.s32.totalorder %s556_s15, 2 }
   0x6   : > { %s817_s14 = smov (%p29_p0, %s27_s14), 0  ;;  %s68_s17 = sadd.s32 1, %s686_s10 }
   0x7   : > { %p77_p3 = por %p76_p2, %p75_p1  ;;  %s64_s16 = ssub.s32 %s694_s12, %s817_s14 }
   0x8   : > { %p66_p5 = scmp.eq.s32.totalorder %s64_s16, 0  ;;  %p750_p6 = por %p107_p4, %p75_p1 }
   0x9   : > { %p560_p7 = scmp.ge.s32.totalorder %s698_s13, 3 }
   0xa   : > { %s755_s19 = scalar_select %p66_p5, %s686_s10, %s68_s17  }
   0xb   : > { %141 = sbr.rel (%p560_p7) target bundleno = 36 (0x24), region = 20 }
  0x10   : > { %144 = sbr.rel (!%p77_p3) target bundleno = 36 (0x24), region = 24  ;;  %s146_s20 = sand.u32 (%p77_p3), 1, %s686_s10  }
  0x11   : > { %s562_s21 = sshll.u32 (%p77_p3), %s694_s12, 2  ;;  %s561_s22 = sshll.u32 (%p77_p3), %s146_s20, 6 }
  0x12   : > { %s763_s25 = scalar_lea.vmem (%p77_p3), %s809_s1, %s562_s21  ;;  %s148_s26 = scalar_lea.vmem (%p77_p3), [#allocation3], %s561_s22 }
  0x13   : > { %v170_v0 = vld [vmem:[%s763_s25] sm:$0xf] (%p77_p3)  ;;  %v172_v1 = vld [vmem:[%s763_s25 + $0xc] sm:$0xf] (%p77_p3)  ;;  %v174_v2 = vld [vmem:[%s763_s25 + $0x18] sm:$0xf] (%p77_p3) }
  0x14   : > { %171 = vst [vmem:[%s148_s26] sm:$0xf] (%p77_p3), %v170_v0  ;;  %v176_v3 = vld [vmem:[%s763_s25 + $0x24] sm:$0xf] (%p77_p3)  ;;  %v178_v4 = vld [vmem:[%s763_s25 + $0x30] sm:$0xf] (%p77_p3) }
  0x15   : > { %173 = vst [vmem:[%s148_s26 + $0x4] sm:$0xf] %v172_v1  ;;  %v180_v5 = vld [vmem:[%s763_s25 + $0x3c] sm:$0xf]  ;;  %v182_v6 = vld [vmem:[%s763_s25 + $0x48] sm:$0xf] }
  0x16   : > { %175 = vst [vmem:[%s148_s26 + $0x8] sm:$0xf] %v174_v2  ;;  %v184_v7 = vld [vmem:[%s763_s25 + $0x54] sm:$0xf]  ;;  %v186_v8 = vld [vmem:[%s763_s25 + $0x60] sm:$0xf] }
  0x17   : > { %177 = vst [vmem:[%s148_s26 + $0xc] sm:$0xf] %v176_v3  ;;  %v188_v9 = vld [vmem:[%s763_s25 + $0x6c] sm:$0xf]  ;;  %v190_v10 = vld [vmem:[%s763_s25 + $0x78] sm:$0xf] }
  0x18   : > { %179 = vst [vmem:[%s148_s26 + $0x10] sm:$0xf] %v178_v4  ;;  %v192_v11 = vld [vmem:[%s763_s25 + $0x84] sm:$0xf]  ;;  %v194_v12 = vld [vmem:[%s763_s25 + $0x90] sm:$0xf] }
  0x19   : > { %181 = vst [vmem:[%s148_s26 + $0x14] sm:$0xf] %v180_v5  ;;  %v196_v13 = vld [vmem:[%s763_s25 + $0x9c] sm:$0xf]  ;;  %v198_v14 = vld [vmem:[%s763_s25 + $0xa8] sm:$0xf] }
  0x1a   : > { %183 = vst [vmem:[%s148_s26 + $0x18] sm:$0xf] %v182_v6  ;;  %v200_v15 = vld [vmem:[%s763_s25 + $0xb4] sm:$0xf] }
  0x1b   : > { %185 = vst [vmem:[%s148_s26 + $0x1c] sm:$0xf] %v184_v7 }
  0x1c   : > { %187 = vst [vmem:[%s148_s26 + $0x20] sm:$0xf] %v186_v8 }
  0x1d   : > { %189 = vst [vmem:[%s148_s26 + $0x24] sm:$0xf] %v188_v9 }
  0x1e   : > { %191 = vst [vmem:[%s148_s26 + $0x28] sm:$0xf] %v190_v10 }
  0x1f   : > { %193 = vst [vmem:[%s148_s26 + $0x2c] sm:$0xf] %v192_v11 }
  0x20   : > { %195 = vst [vmem:[%s148_s26 + $0x30] sm:$0xf] %v194_v12 }
  0x21   : > { %197 = vst [vmem:[%s148_s26 + $0x34] sm:$0xf] %v196_v13 }
  0x22   : > { %199 = vst [vmem:[%s148_s26 + $0x38] sm:$0xf] %v198_v14 }
  0x23   : > { %201 = vst [vmem:[%s148_s26 + $0x3c] sm:$0xf] %v200_v15 }
  0x24 PF: > { %p563_p8 = scmp.ge.s32.totalorder %s698_s13, 1  ;;  %p256_p9 = scmp.lt.s32.totalorder %s698_s13, 4 }
  0x26   : > { %p257_p10 = pnand %p563_p8, %p256_p9 }
  0x27   : > { %s263_s27 = sand.u32 (!%p257_p10), 1, %s682_s9  }
  0x28   : > { %260 = sbr.rel (%p257_p10) target bundleno = 223 (0xdf), region = 65  ;;  %s564_s28 = sshll.u32 (!%p257_p10), %s263_s27, 6 }
  0x29   : > { %s265_s29 = scalar_lea.vmem (!%p257_p10), [#allocation3], %s564_s28  ;;  %s565_s4 = sshll.u32 (!%p257_p10), %s263_s27, 3 }
  0x2a   : > { %s290_s5 = scalar_lea.vmem (!%p257_p10), [#allocation4], %s565_s4 }
  0x2d   : > { %v614_v16 = vld [vmem:[%s265_s29 + $0x38] sm:$0xff]  ;;  %v613_v17 = vld [vmem:[%s265_s29 + $0x30] sm:$0xff]  ;;  %v612_v18 = vld [vmem:[%s265_s29 + $0x28] sm:$0xff]  ;;  %s603_s6 = sshll.u32 (%p750_p6), %s690_s11, 2 }
  0x2e   : > { %382 = vmatpush.bf16.msra.mxu0 %v614_v16  ;;  %v611_v19 = vld [vmem:[%s265_s29 + $0x20] sm:$0xff]  ;;  %v610_v20 = vld [vmem:[%s265_s29 + $0x18] sm:$0xff]  ;;  %v609_v21 = vld [vmem:[%s265_s29 + $0x10] sm:$0xff]  ;;  %s420_s9 = scalar_lea.vmem (%p750_p6), %s810_s2, %s603_s6 }
  0x2f   : > { %v608_v22 = vld [vmem:[%s265_s29 + $0x8] sm:$0xff]  ;;  %v607_v23 = vld [vmem:[%s265_s29] sm:$0xff] }
  0x30   : > { %v606_v24 = vld [vmem:[%s808_s0] sm:$0xff] }
  0x32   : > { %383 = vmatpush.bf16.msra.mxu0 %v613_v17 }
  0x36   : > { %384 = vmatpush.bf16.msra.mxu0 %v612_v18 }
  0x3a   : > { %385 = vmatpush.bf16.msra.mxu0 %v611_v19 }
  0x3e   : > { %386 = vmatpush.bf16.msra.mxu0 %v610_v20 }
  0x42   : > { %387 = vmatpush.bf16.msra.mxu0 %v609_v21 }
  0x46   : > { %388 = vmatpush.bf16.msra.mxu0 %v608_v22 }
  0x4a   : > { %389 = vmatpush.bf16.msra.mxu0 %v607_v23 }
  0x4d   : > { %390 = vmatmul.bf16.vlgmr.msra.gmra.mxu0 %v606_v24 }
  0xca   : > { %v391_v25 = vpop.f32.mrf.mxu0 }
  0xd1   : > { %415 = sbr.rel (!%p750_p6) target bundleno = 223 (0xdf), region = 81 }
  0xd2   : > { %v393_v26 = vpop.f32.mrf.mxu0 }
  0xd3   : > { %v618_v27 = vpack.c.bf16 %v393_v26, %v391_v25 }
  0xd5   : > { %619 = vst [vmem:[%s290_s5] sm:$0xff] %v618_v27  }
  0xdc   : > { %v437_v28 = vld [vmem:[%s290_s5] sm:$0xf]  ;;  %v439_v29 = vld [vmem:[%s290_s5 + $0x4] sm:$0xf] }
  0xdd   : > { %438 = vst [vmem:[%s420_s9] sm:$0xf] %v437_v28 }
  0xde   : > { %440 = vst [vmem:[%s420_s9 + $0xc] sm:$0xf] %v439_v29 }
  0xdf PF: > { %s12_s13 = sadd.s32 1, %s698_s13   ;;  %s812_s9 = smov %s686_s10 }
  0xe0   : > { %p9_p11 = scmp.ge.s32.totalorder %s12_s13, 5   ;;  %s813_s10 = smov %s755_s19 }
  0xe1   : > { %s814_s11 = smov %s694_s12  ;;  %s815_s12 = smov %s817_s14 }
  0xe2   :  { %11 = sbr.rel (!%p9_p11) target bundleno = 3 (0x3), region = 156 }

// kernel: moe_prefix_attention_forward.3
= control target key start
LH: loop header
LB: loop body
LE: loop exit
PB: predicated region body
PF: predicated region fallthrough
CT: control target
= control target key end

     0   :  { %s1782_s0 = inlined_call_operand.vmem [shape: bf16[2,8,384], index: 0, kind: input, shape index: {}, may-alias: {0,1,2}]   ;;  %s1783_s1 = inlined_call_operand.vmem [shape: bf16[2,8,384], index: 1, kind: input, shape index: {}, may-alias: {0,1,2}]   ;;  %s1784_s2 = inlined_call_operand.vmem [shape: bf16[2,8,384], index: 2, kind: input, shape index: {}, may-alias: {0,1,2}]   ;;  %s1785_s3 = inlined_call_operand.vmem [shape: bf16[4,4,32], index: 3, kind: input, shape index: {}]   ;;  %s1786_s4 = inlined_call_operand.vmem [shape: bf16[4,4,32], index: 4, kind: input, shape index: {}]   ;;  %s1787_s5 = inlined_call_operand.vmem [shape: bf16[4,8,8], index: 5, kind: input, shape index: {}]   ;;  %s1788_s6 = inlined_call_operand.vmem [shape: f32[2,1,8], index: 6, kind: input, shape index: {}]   ;;  %s1789_s7 = inlined_call_operand.vmem [shape: bf16[128,128], index: 7, kind: input, shape index: {}]   ;;  %s1790_s8 = inlined_call_operand.vmem [shape: f32[1,128], index: 8, kind: input, shape index: {}]   ;;  %s1791_s9 = inlined_call_operand.hbm [shape: f32[2,8,128], index: 9, kind: output, shape index: {}]  }
   0x1   :  { %1792 = sst [smem:[#allocation7_spill]] %s1782_s0 }
   0x2   :  { %1793 = sst [smem:[#allocation8_spill]] %s1783_s1 }
   0x3   :  { %14 = vsyncpa [#allocation5], 0 }
   0x4   :  { %16 = vsyncpa [#allocation5 + $0x1], 0  ;;  %s1498_s30 = smov 0   ;;  %s1500_s10 = smov 0  }
   0x5   :  { %s1502_s11 = smov 0   ;;  %s1504_s12 = smov 0  }
   0x6   :  { %s1506_s13 = smov 0   ;;  %s1508_s14 = smov 0  }
   0x7 LB: > { %s1193_s15 = sadd.s32 4294967295, %s1443_s14   ;;  %s1194_s16 = sadd.s32 4294967294, %s1443_s14   ;;  %s1443_s14 = sphi %s1508_s14, %s22_s14   ;;  %s1439_s13 = sphi %s1506_s13, %s1802_s13   ;;  %s1435_s12 = sphi %s1504_s12, %s1801_s12   ;;  %s1431_s11 = sphi %s1502_s11, %s1800_s11   ;;  %s1427_s10 = sphi %s1500_s10, %s1799_s10   ;;  %s1423_s30 = sphi %s1498_s30, %s1798_s30  }
   0x8   : > { %s34_s17 = sadd.s32 1, %s1439_s13  ;;  %s259_s18 = sadd.s32 1, %s1431_s11 }
   0x9   : > { %p36_p0 = scmp.ge.s32.totalorder %s34_s17, 2  ;;  %p269_p1 = scmp.ne.s32.totalorder %s1431_s11, %s1427_s10 }
   0xa   : > { %p270_p2 = scmp.eq.s32.totalorder %s1193_s15, 1  ;;  %p275_p3 = scmp.ne.s32.totalorder %s1427_s10, %s1423_s30 }
   0xb   : > { %s1804_s17 = smov (%p36_p0, %s34_s17), 0  ;;  %p276_p5 = scmp.eq.s32.totalorder %s1194_s16, 1 }
   0xc   : > { %p1538_p4 = por %p270_p2, %p269_p1  ;;  %s254_s20 = ssub.s32 %s1439_s13, %s1804_s17 }
   0xd   : > { %p1198_p6 = scmp.ge.s32.totalorder %s1443_s14, 1  ;;  %p257_p7 = scmp.eq.s32.totalorder %s254_s20, 0 }
   0xe   : > { %p1545_p8 = por %p276_p5, %p275_p3  ;;  %p349_p9 = scmp.lt.s32.totalorder %s1443_s14, 3 }
   0xf   : > { %s1551_s22 = scalar_select %p257_p7, %s1431_s11, %s259_s18  }
  0x10   : > { %p350_p10 = pnand %p1198_p6, %p349_p9 }
  0x11   : > { %p408_p11 = scmp.lt.s32.totalorder (!%p350_p10), %s1435_s12, 1  ;;  %s1796_s1 = sld [smem:[#allocation8_spill]] (!%p350_p10) }
  0x12   : > { %353 = sbr.rel (%p350_p10) target bundleno = 1053 (0x41d), region = 56  ;;  %s1797_s0 = sld [smem:[#allocation7_spill]] (!%p350_p10) }
  0x13   : > { %s1446_s15 = smov (!%p350_p10), 32   ;;  %s1447_s16 = smov (!%p350_p10), 64  }
  0x14   : > { %s405_s28 = sand.u32 (!%p350_p10), 1, %s1427_s10  }
  0x15   : > { %s1199_s20 = sshll.u32 (!%p350_p10), %s405_s28, 3 }
  0x16   : > { %s407_s27 = scalar_lea.vmem (!%p350_p10), [#allocation4], %s1199_s20 }
  0x17   : > { %vm498_vm0 = vcmask 261120   ;;  %v521_v0 = vld [vmem:[%s1785_s3] sm:$0x3]  ;;  %s409_s25 = scalar_select %p408_p11, %s1435_s12, 1  ;;  %vm442_vm1 = vcmask 257024   ;;  %vm538_vm2 = vcmask 64512  }
  0x18   : > { %v523_v1 = vsel %vm498_vm0, %v521_v0, 0  ;;  %v1585_v11 = vld [vmem:[%s1787_s5] sm:$0xff]   ;;  %vm542_vm3 = vcmask 31744   ;;  %vm586_vm4 = vcmask 1041408   ;;  %vm566_vm5 = vcmask 1043456   ;;  %v1223_v63 = vld [vmem:[%s1787_s5 + $0x8] sm:$0xff]  }
  0x19   : > { %532 = vmatpush.bf16.xpose.msra.mxu1 %v523_v1  ;;  %s1559_s26 = smul.u32 12, %s409_s25  ;;  %s435_s29 = scalar_lea.vmem %s1788_s6, %s409_s25  ;;  %v519_v14 = vunpack.c.l.bf16 %v1585_v11  ;;  %v561_v24 = vld [vmem:[%s1786_s4] sm:$0x3]  ;;  %v1217_v42 = vld [vmem:[%s1785_s3 + $0x2] sm:$0x3]  ;;  %v744_v0 = vunpack.c.l.bf16 %v1223_v63  ;;  %v633_v1 = vunpack.c.h.bf16 %v1585_v11  ;;  %v855_v11 = vunpack.c.h.bf16 %v1223_v63 }
  0x1a   : > { %s1445_s25 = smov 96   ;;  %v1587_v12 = vld [vmem:[%s435_s29] ss:$0 sm:$0xff]  ;;  %v588_v26 = vsel %vm586_vm4, %v561_v24, 0  ;;  %v638_v47 = vsel %vm498_vm0, %v1217_v42, 0  ;;  %vm952_vm6 = vcmask 523264  }
  0x1b   : > { %s1568_s18 = scalar_lea.vmem %s1796_s1, %s1559_s26  ;;  %s416_s24 = scalar_lea.vmem %s1797_s0, %s1559_s26  ;;  %597 = vmatpush.bf16.msra.mxu3 %v588_v26  ;;  %v1224_v50 = vld [vmem:[%s1785_s3 + $0x4] sm:$0x3]  ;;  %v1231_v54 = vld [vmem:[%s1785_s3 + $0x6] sm:$0x3]  ;;  %vm954_vm7 = vcmask 785408  }
  0x1c   : > { %v1203_v2 = vld [vmem:[%s1568_s18 + $0x4] sm:$0xf]  ;;  %v489_v3 = vld [vmem:[%s416_s24] sm:$0xf]  ;;  %s1603_s23 = scalar_lea.vmem %s1784_s2, %s1559_s26  ;;  %v749_v53 = vsel %vm498_vm0, %v1224_v50, 0  ;;  %v860_v56 = vsel %vm498_vm0, %v1231_v54, 0 }
  0x1d   : > { %443 = vst.msk [vmem:[#allocation2] sm:$0xf] %vm442_vm1, %v1203_v2  ;;  %v490_v4 = vunpack.c.l.bf16 %v489_v3  ;;  %v1205_v9 = vld [vmem:[%s1568_s18 + $0x4] sm:$0xf]  ;;  %v1204_v23 = vld [vmem:[%s1603_s23 + $0x8] sm:$0xf] }
  0x1e   : > { %448 = vrot.lane.b32.xlu1 %v1205_v9, %s1445_s25  ;;  %v1207_v17 = vld [vmem:[%s1568_s18 + $0x4] sm:$0xf]  ;;  %445 = vst.msk [vmem:[#allocation3] sm:$0xf] %vm442_vm1, %v1204_v23  ;;  %v1206_v57 = vld [vmem:[%s1603_s23 + $0x8] sm:$0xf] }
  0x1f   : > { %v491_v5 = vmul.f32 0.17675781, %v490_v4  ;;  %462 = vrot.lane.b32.xlu2 %v1207_v17, %s1447_s16  ;;  %v1209_v21 = vld [vmem:[%s1568_s18 + $0x4] sm:$0xf]  ;;  %v1208_v26 = vld [vmem:[%s1603_s23 + $0x8] sm:$0xf]  ;;  %s1269_s29 = sshll.u32 %s1435_s12, 3 }
  0x20   : > { %s1051_s24 = scalar_lea.hbm %s1791_s9, %s1269_s29  ;;  %s1053_s26 = sshll.u32 %s407_s27, 4  ;;  %s1054_s26 = int_to_ptr.vmem [resolvable:$true] %s1053_s26 }
  0x21   : > { %v492_v6 = vpack.c.bf16 %v491_v5, %v491_v5  ;;  %s1055_s18 = sshll.u32 %s1051_s24, 4  ;;  %s1040_s0 = scalar_lea.sflag [#allocation5], %s405_s28  ;;  %s1056_s18 = int_to_ptr.hbm [resolvable:$true] %s1055_s18 }
  0x22   : > { %s1379_s12 = sshra.s32 %s1056_s18, 4  ;;  %s1380_s12 = int_to_ptr.hbm [resolvable:$true] %s1379_s12 }
  0x23   : > { %1212 = vmatmul.msk.bf16.vlgmr.msra.gmra.mxu1 %vm498_vm0, %v492_v6  ;;  %s1381_s1 = scalar_lea.hbm %s1380_s12, 8  ;;  %p1386_p1 = scmp.lt.s32.totalorder %s1380_s12, %s1791_s9 }
  0x24   : > { %v493_v7 = vld [vmem:[#allocation2] sm:$0xf]  ;;  %p1382_p12 = scmp.ne.s32.totalorder %s1380_s12, %s1381_s1 }
  0x25   : > { %v503_v8 = vsel %vm498_vm0, %v493_v7, 0  ;;  %v494_v27 = vld [vmem:[#allocation3] sm:$0xf] }
  0x26   : > { %512 = vmatpush.bf16.xpose.msra.mxu0 %v503_v8  ;;  %610 = vrot.lane.b32.xlu1 %v492_v6, %s1445_s25  ;;  %v568_v28 = vsel %vm566_vm5, %v494_v27, 0  ;;  %p1383_p13 = pnand %p1382_p12, %p1538_p4 }
  0x27   : > { %476 = vrot.lane.b32.xlu2 %v1209_v21, %s1446_s15  ;;  %577 = vmatpush.bf16.msra.mxu2 %v568_v28  ;;  %v1210_v28 = vld [vmem:[%s1603_s23 + $0x8] sm:$0xf]  ;;  %s1385_s23 = scalar_lea.hbm %s1791_s9, 16 }
  0x28   : > { %p1384_p0 = pneg %p1383_p13  ;;  %p1387_p2 = scmp.lt.s32.totalorder %s1385_s23, %s1381_s1 }
  0x2a   : > { %p1388_p3 = por %p1387_p2, %p1386_p1 }
  0x2c   : > { %p1389_p5 = pnand %p1388_p3, %p1384_p0 }
  0x2d   : > { %1211 = vmatmul.msk.bf16.vlgmr.msra.gmra.mxu0 %vm498_vm0, %v492_v6 }
  0x2e   : > { %832 = vrot.lane.b32.xlu1 %v492_v6, %s1446_s15 }
  0x79   : > { %v463_v30 = vpop.permute.xlu2 %462 }
  0x7a   : > { %466 = vst.msk [vmem:[#allocation2 + $0x8] sm:$0xf] %vm442_vm1, %v463_v30 }
  0x81   : > { %v718_v35 = vld [vmem:[#allocation2 + $0x8] sm:$0xf]  ;;  %v477_v36 = vpop.permute.xlu2 %476 }
  0x82   : > { %v727_v37 = vsel %vm498_vm0, %v718_v35, 0  ;;  %480 = vst.msk [vmem:[#allocation2 + $0xc] sm:$0xf] %vm442_vm1, %v477_v36 }
  0x83   : > { %736 = vmatpush.bf16.xpose.msrb.mxu2 %v727_v37 }
  0x89   : > { %v829_v48 = vld [vmem:[#allocation2 + $0xc] sm:$0xf] }
  0x8a   : > { %v838_v49 = vsel %vm498_vm0, %v829_v48, 0 }
  0x90   : > { %v449_v25 = vpop.permute.xlu1 %448 }
  0x91   : > { %452 = vst.msk [vmem:[#allocation2 + $0x4] sm:$0xf] %vm442_vm1, %v449_v25 }
  0x98   : > { %v606_v29 = vld [vmem:[#allocation2 + $0x4] sm:$0xf]  ;;  %v611_v52 = vpop.permute.xlu1 %610 }
  0x99   : > { %v616_v31 = vsel %vm498_vm0, %v606_v29, 0 }
  0x9a   : > { %625 = vmatpush.bf16.xpose.msrb.mxu3 %v616_v31 }
  0xa0   : > { %v534_v10 = vpop.f32.mrf.mxu1  ;;  %v833_v55 = vpop.permute.xlu1 %832 }
  0xa1   : > { %v543_v22 = vsel %vm542_vm3, %v534_v10, -inf }
  0xa8   : > { %v536_v13 = vpop.f32.mrf.mxu1 }
  0xaa   : > { %v514_v15 = vpop.f32.mrf.mxu0 }
  0xab   : > { %v515_v16 = vadd.f32 %v1587_v12, %v514_v15 }
  0xad   : > { %v520_v18 = vadd.f32 %v519_v14, %v515_v16 }
  0xaf   : > { %v539_v19 = vsel %vm538_vm2, %v520_v18, -inf }
  0xb0   : > { %540 = vmax.xlane.f32.xlu0 %v539_v19 }
  0xb2   : > { %v516_v20 = vpop.f32.mrf.mxu0 }
  0xb8   : > { %544 = vmax.xlane.f32.xlu0 %v543_v22 }
  0xcc   : > { %721 = vrot.lane.b32.xlu0 %v492_v6, %s1447_s16 }
  0xd4   : > { %455 = vrot.lane.b32.xlu0 %v1206_v57, %s1445_s25 }
 0x123   : > { %v541_v32 = vpop.xlane.xlu0 %540 }
 0x12b   : > { %v545_v33 = vpop.xlane.xlu0 %544 }
 0x12c   : > { %v546_v34 = vmax.f32 %v541_v32, %v545_v33  ;;  %v1219_v32 = vld [vmem:[%s1786_s4 + $0x2] sm:$0x3] }
 0x12d   : > { %v700_v33 = vsel %vm586_vm4, %v1219_v32, 0 }
 0x12e   : > { %v547_v38 = vsub.f32 %v520_v18, %v546_v34  ;;  %v550_v39 = vsub.f32 %v534_v10, %v546_v34  ;;  %709 = vmatpush.bf16.msrb.mxu1 %v700_v33  ;;  %v1226_v34 = vld [vmem:[%s1786_s4 + $0x4] sm:$0x3] }
 0x12f   : > { %v811_v35 = vsel %vm586_vm4, %v1226_v34, 0 }
 0x130   : > { %v548_v40 = vmul.f32 1.442695, %v547_v38  ;;  %v551_v41 = vmul.f32 1.442695, %v550_v39 }
 0x132   : > { %1341 = vpow2.f32 %v548_v40  ;;  %820 = vmatpush.bf16.msra.mxu1 %v811_v35 }
 0x133   : > { %1343 = vpow2.f32 %v551_v41 }
 0x138   : > { %v1620_v43 = vpop.eup %1341 }
 0x139   : > { %v1622_v44 = vpop.eup %1343  ;;  %v562_v45 = vpack.c.bf16 %v1620_v43, %v1620_v43 }
 0x13a   : > { %v560_v46 = vpack.c.bf16 %v1622_v44, %v1622_v44 }
 0x13b   : > { %1213 = vmatmul.msk.bf16.vlgmr.msra.gmra.mxu2 %vm538_vm2, %v562_v45  ;;  %v1233_v45 = vld [vmem:[%s1786_s4 + $0x6] sm:$0x3] }
 0x13c   : > { %1214 = vmatmul.msk.bf16.vlgmr.msra.gmra.mxu3 %vm542_vm3, %v560_v46  ;;  %847 = vmatpush.bf16.xpose.msra.mxu2 %v838_v49 }
 0x13d   : > { %647 = vmatpush.bf16.xpose.msra.mxu3 %v638_v47 }
 0x13e   : > { %v722_v51 = vpop.permute.xlu0 %721 }
 0x146   : > { %v456_v29 = vpop.permute.xlu0 %455 }
 0x147   : > { %459 = vst.msk [vmem:[#allocation3 + $0x4] sm:$0xf] %vm442_vm1, %v456_v29 }
 0x14b   : > { %1222 = vmatmul.msk.bf16.vlgmr.msrb.gmra.mxu2 %vm498_vm0, %v722_v51 }
 0x14c   : > { %1215 = vmatmul.msk.bf16.vlgmr.msrb.gmra.mxu3 %vm498_vm0, %v611_v52 }
 0x14d   : > { %758 = vmatpush.bf16.xpose.msrb.mxu3 %v749_v53 }
 0x14e   : > { %v608_v30 = vld [vmem:[#allocation3 + $0x4] sm:$0xf] }
 0x14f   : > { %v681_v31 = vsel %vm566_vm5, %v608_v30, 0 }
 0x150   : > { %690 = vmatpush.bf16.msrb.mxu0 %v681_v31 }
 0x15b   : > { %1229 = vmatmul.msk.bf16.vlgmr.msra.gmra.mxu2 %vm498_vm0, %v833_v55 }
 0x15c   : > { %1218 = vmatmul.msk.bf16.vlgmr.msra.gmra.mxu3 %vm498_vm0, %v611_v52  ;;  %v922_v52 = vsel %vm586_vm4, %v1233_v45, 0 }
 0x15d   : > { %869 = vmatpush.bf16.xpose.msra.mxu3 %v860_v56 }
 0x16c   : > { %1225 = vmatmul.msk.bf16.vlgmr.msrb.gmra.mxu3 %vm498_vm0, %v722_v51 }
 0x17c   : > { %1232 = vmatmul.msk.bf16.vlgmr.msra.gmra.mxu3 %vm498_vm0, %v833_v55 }
 0x1be   : > { %v579_v58 = vpop.f32.mrf.mxu2 }
 0x1bf   : > { %v599_v59 = vpop.f32.mrf.mxu3 }
 0x1c0   : > { %v1648_v60 = vadd.f32 %v599_v59, %v579_v58 }
 0x1c6   : > { %v581_v61 = vpop.f32.mrf.mxu2 }
 0x1c7   : > { %v601_v62 = vpop.f32.mrf.mxu3 }
 0x1ce   : > { %v738_v2 = vpop.f32.mrf.mxu2 }
 0x1cf   : > { %v627_v3 = vpop.f32.mrf.mxu3  ;;  %v739_v4 = vadd.f32 %v1587_v12, %v738_v2 }
 0x1d0   : > { %v628_v5 = vadd.f32 %v1587_v12, %v627_v3 }
 0x1d1   : > { %v1656_v6 = vadd.f32 %v744_v0, %v739_v4 }
 0x1d2   : > { %v634_v7 = vadd.f32 %v633_v1, %v628_v5 }
 0x1d3   : > { %v764_v8 = vsel %vm538_vm2, %v1656_v6, -inf }
 0x1d4   : > { %v653_v9 = vsel %vm538_vm2, %v634_v7, -inf  ;;  %765 = vmax.xlane.f32.xlu0 %v764_v8 }
 0x1d5   : > { %654 = vmax.xlane.f32.xlu2 %v653_v9 }
 0x1d6   : > { %v740_v10 = vpop.f32.mrf.mxu2 }
 0x1d7   : > { %v629_v13 = vpop.f32.mrf.mxu3 }
 0x1de   : > { %v849_v14 = vpop.f32.mrf.mxu2 }
 0x1df   : > { %v649_v15 = vpop.f32.mrf.mxu3  ;;  %v850_v16 = vadd.f32 %v1587_v12, %v849_v14 }
 0x1e0   : > { %v656_v17 = vsel %vm542_vm3, %v649_v15, -inf }
 0x1e1   : > { %657 = vmax.xlane.f32.xlu1 %v656_v17  ;;  %v1663_v18 = vadd.f32 %v855_v11, %v850_v16  ;;  %v553_v17 = vsel %vm538_vm2, %v1620_v43, 0.0 }
 0x1e3   : > { %v875_v20 = vsel %vm538_vm2, %v1663_v18, -inf }
 0x1e6   : > { %v851_v19 = vpop.f32.mrf.mxu2 }
 0x1e7   : > { %v651_v21 = vpop.f32.mrf.mxu3 }
 0x1e8   : > { %v556_v21 = vsel %vm542_vm3, %v1622_v44, 0.0 }
 0x1e9   : > { %876 = vmax.xlane.f32.xlu1 %v875_v20 }
 0x1ef   : > { %v760_v22 = vpop.f32.mrf.mxu3 }
 0x1f0   : > { %v767_v23 = vsel %vm542_vm3, %v760_v22, -inf }
 0x1f1   : > { %768 = vmax.xlane.f32.xlu2 %v767_v23 }
 0x1f7   : > { %v762_v24 = vpop.f32.mrf.mxu3 }
 0x1ff   : > { %v1668_v25 = vpop.f32.mrf.mxu3 }
 0x200   : > { %v878_v12 = vsel %vm542_vm3, %v1668_v25, -inf }
 0x201   : > { %879 = vmax.xlane.f32.xlu1 %v878_v12 }
 0x207   : > { %v873_v27 = vpop.f32.mrf.mxu3 }
 0x209   : > { %469 = vrot.lane.b32.xlu2 %v1208_v26, %s1447_s16 }
 0x21a   : > { %483 = vrot.lane.b32.xlu1 %v1210_v28, %s1446_s15 }
 0x247   : > { %v766_v53 = vpop.xlane.xlu0 %765 }
 0x248   : > { %v655_v36 = vpop.xlane.xlu2 %654 }
 0x254   : > { %v658_v37 = vpop.xlane.xlu1 %657 }
 0x255   : > { %v659_v38 = vmax.f32 %v655_v36, %v658_v37 }
 0x257   : > { %v660_v39 = vsub.f32 %v634_v7, %v659_v38  ;;  %v663_v40 = vsub.f32 %v649_v15, %v659_v38 }
 0x259   : > { %v661_v41 = vmul.f32 1.442695, %v660_v39  ;;  %v664_v42 = vmul.f32 1.442695, %v663_v40 }
 0x25b   : > { %1345 = vpow2.f32 %v661_v41 }
 0x25c   : > { %1347 = vpow2.f32 %v664_v42  ;;  %v877_v61 = vpop.xlane.xlu1 %876 }
 0x261   : > { %v1346_v46 = vpop.eup %1345 }
 0x262   : > { %v1348_v47 = vpop.eup %1347  ;;  %v666_v48 = vsel %vm538_vm2, %v1346_v46, 0.0  ;;  %v676_v49 = vpack.c.bf16 %v1346_v46, %v1346_v46 }
 0x263   : > { %v669_v50 = vsel %vm542_vm3, %v1348_v47, 0.0  ;;  %667 = vadd.xlane.f32.xlu0 %v666_v48  ;;  %v673_v51 = vpack.c.bf16 %v1348_v47, %v1348_v47 }
 0x264   : > { %670 = vadd.xlane.f32.xlu2 %v669_v50  ;;  %v769_v54 = vpop.xlane.xlu2 %768  ;;  %1220 = vmatmul.msk.bf16.vlgmr.msrb.gmra.mxu0 %vm538_vm2, %v676_v49 }
 0x265   : > { %1221 = vmatmul.msk.bf16.vlgmr.msrb.gmra.mxu1 %vm542_vm3, %v673_v51  ;;  %v770_v55 = vmax.f32 %v766_v53, %v769_v54 }
 0x266   : > { %931 = vmatpush.bf16.msrb.mxu1 %v922_v52 }
 0x267   : > { %v771_v56 = vsub.f32 %v1656_v6, %v770_v55  ;;  %v774_v57 = vsub.f32 %v760_v22, %v770_v55 }
 0x269   : > { %v772_v58 = vmul.f32 1.442695, %v771_v56  ;;  %v775_v59 = vmul.f32 1.442695, %v774_v57 }
 0x26b   : > { %1349 = vpow2.f32 %v772_v58 }
 0x26c   : > { %1351 = vpow2.f32 %v775_v59  ;;  %v470_v62 = vpop.permute.xlu2 %469  ;;  %v1279_v59 = vld [vmem:[%s1789_s7 + $0x38] sm:$0xff] }
 0x26d   : > { %473 = vst.msk [vmem:[#allocation3 + $0x8] sm:$0xf] %vm442_vm1, %v470_v62  ;;  %1025 = vmatpush.bf16.msrb.mxu2 %v1279_v59  ;;  %v1276_v62 = vld [vmem:[%s1789_s7 + $0x20] sm:$0xff] }
 0x271   : > { %v1350_v63 = vpop.eup %1349 }
 0x272   : > { %v1352_v0 = vpop.eup %1351  ;;  %v777_v1 = vsel %vm538_vm2, %v1350_v63, 0.0  ;;  %v787_v7 = vpack.c.bf16 %v1350_v63, %v1350_v63  ;;  %v1275_v63 = vld [vmem:[%s1789_s7 + $0x18] sm:$0xff] }
 0x273   : > { %v784_v2 = vpack.c.bf16 %v1352_v0, %v1352_v0  ;;  %778 = vadd.xlane.f32.xlu0 %v777_v1  ;;  %v780_v14 = vsel %vm542_vm3, %v1352_v0, 0.0  ;;  %v1274_v0 = vld [vmem:[%s1789_s7 + $0x10] sm:$0xff]  ;;  %v1273_v1 = vld [vmem:[%s1789_s7 + $0x8] sm:$0xff] }
 0x274   : > { %v880_v3 = vpop.xlane.xlu1 %879  ;;  %v720_v4 = vld [vmem:[#allocation3 + $0x8] sm:$0xf] }
 0x275   : > { %v881_v5 = vmax.f32 %v877_v61, %v880_v3  ;;  %1228 = vmatmul.msk.bf16.vlgmr.msra.gmra.mxu1 %vm542_vm3, %v784_v2  ;;  %v792_v6 = vsel %vm566_vm5, %v720_v4, 0  ;;  %v1278_v61 = vld [vmem:[%s1789_s7 + $0x30] sm:$0xff]  ;;  %v1272_v2 = vld [vmem:[%s1789_s7] sm:$0xff] }
 0x276   : > { %801 = vmatpush.bf16.msra.mxu0 %v792_v6  ;;  %1026 = vmatpush.bf16.msrb.mxu2 %v1278_v61 }
 0x277   : > { %v882_v8 = vsub.f32 %v1663_v18, %v881_v5  ;;  %v885_v9 = vsub.f32 %v1668_v25, %v881_v5 }
 0x279   : > { %v883_v10 = vmul.f32 1.442695, %v882_v8  ;;  %v886_v13 = vmul.f32 1.442695, %v885_v9  ;;  %1227 = vmatmul.msk.bf16.vlgmr.msra.gmra.mxu0 %vm538_vm2, %v787_v7 }
 0x27b   : > { %1353 = vpow2.f32 %v883_v10  ;;  %781 = vadd.xlane.f32.xlu0 %v780_v14  ;;  %v1340_v10 = vld [vmem:[%s1790_s8] ss:$0 sm:$0xff] }
 0x27c   : > { %1355 = vpow2.f32 %v886_v13 }
 0x281   : > { %v1354_v11 = vpop.eup %1353 }
 0x282   : > { %v1356_v15 = vpop.eup %1355  ;;  %v888_v16 = vsel %vm538_vm2, %v1354_v11, 0.0  ;;  %v898_v43 = vpack.c.bf16 %v1354_v11, %v1354_v11 }
 0x283   : > { %v895_v19 = vpack.c.bf16 %v1356_v15, %v1356_v15  ;;  %889 = vadd.xlane.f32.xlu1 %v888_v16  ;;  %554 = vadd.xlane.f32.xlu0 %v553_v17  ;;  %v891_v18 = vsel %vm542_vm3, %v1356_v15, 0.0 }
 0x285   : > { %1235 = vmatmul.msk.bf16.vlgmr.msrb.gmra.mxu1 %vm542_vm3, %v895_v19 }
 0x28b   : > { %892 = vadd.xlane.f32.xlu0 %v891_v18 }
 0x28c   : > { %v484_v20 = vpop.permute.xlu1 %483 }
 0x28d   : > { %487 = vst.msk [vmem:[#allocation3 + $0xc] sm:$0xf] %vm442_vm1, %v484_v20 }
 0x293   : > { %557 = vadd.xlane.f32.xlu0 %v556_v21 }
 0x294   : > { %v831_v22 = vld [vmem:[#allocation3 + $0xc] sm:$0xf] }
 0x295   : > { %v903_v23 = vsel %vm566_vm5, %v831_v22, 0 }
 0x296   : > { %912 = vmatpush.bf16.msrb.mxu0 %v903_v23 }
 0x299   : > { %1234 = vmatmul.msk.bf16.vlgmr.msrb.gmra.mxu0 %vm538_vm2, %v898_v43 }
 0x2d6   : > { %v668_v25 = vpop.xlane.xlu0 %667 }
 0x2d7   : > { %v671_v24 = vpop.xlane.xlu2 %670 }
 0x2d8   : > { %v672_v12 = vadd.f32 %v671_v24, %v668_v25 }
 0x2da   : > { %1357 = vrcp.f32 %v672_v12 }
 0x2e0   : > { %v1358_v29 = vpop.eup %1357 }
 0x2e1   : > { %v692_v26 = vpop.f32.mrf.mxu0 }
 0x2e2   : > { %v711_v27 = vpop.f32.mrf.mxu1 }
 0x2e3   : > { %v712_v28 = vadd.f32 %v711_v27, %v692_v26 }
 0x2e5   : > { %v716_v30 = vmul.f32 %v1358_v29, %v712_v28 }
 0x2e6   : > { %v779_v31 = vpop.xlane.xlu0 %778 }
 0x2e7   : > { %940 = vrot.lane.b32.xlu2 %v716_v30, %s1446_s15 }
 0x2e9   : > { %v694_v44 = vpop.f32.mrf.mxu0 }
 0x2ea   : > { %v713_v32 = vpop.f32.mrf.mxu1 }
 0x2ee   : > { %v782_v33 = vpop.xlane.xlu0 %781 }
 0x2ef   : > { %v783_v34 = vadd.f32 %v782_v33, %v779_v31 }
 0x2f1   : > { %1359 = vrcp.f32 %v783_v34 }
 0x2f2   : > { %v822_v35 = vpop.f32.mrf.mxu1 }
 0x2f6   : > { %v803_v36 = vpop.f32.mrf.mxu0  ;;  %v555_v39 = vpop.xlane.xlu0 %554 }
 0x2f7   : > { %v1360_v37 = vpop.eup %1359  ;;  %v823_v38 = vadd.f32 %v822_v35, %v803_v36  ;;  %v890_v50 = vpop.xlane.xlu1 %889 }
 0x2f9   : > { %v827_v40 = vmul.f32 %v1360_v37, %v823_v38 }
 0x2fa   : > { %v824_v41 = vpop.f32.mrf.mxu1 }
 0x2fb   : > { %944 = vrot.lane.b32.xlu0 %v827_v40, %s1447_s16 }
 0x2fe   : > { %v805_v42 = vpop.f32.mrf.mxu0  ;;  %v893_v45 = vpop.xlane.xlu0 %892 }
 0x2ff   : > { %v894_v51 = vadd.f32 %v893_v45, %v890_v50 }
 0x302   : > { %v933_v46 = vpop.f32.mrf.mxu1 }
 0x306   : > { %v558_v47 = vpop.xlane.xlu0 %557 }
 0x307   : > { %v559_v48 = vadd.f32 %v558_v47, %v555_v39 }
 0x309   : > { %1361 = vrcp.f32 %v559_v48 }
 0x30a   : > { %v935_v49 = vpop.f32.mrf.mxu1  ;;  %1363 = vrcp.f32 %v894_v51 }
 0x30f   : > { %v1362_v52 = vpop.eup %1361 }
 0x310   : > { %v604_v53 = vmul.f32 %v1362_v52, %v1648_v60  ;;  %v1364_v56 = vpop.eup %1363  ;;  %v1277_v60 = vld [vmem:[%s1789_s7 + $0x28] sm:$0xff] }
 0x311   : > { %1027 = vmatpush.bf16.msrb.mxu2 %v1277_v60 }
 0x315   : > { %1028 = vmatpush.bf16.msrb.mxu2 %v1276_v62 }
 0x316   : > { %v914_v54 = vpop.f32.mrf.mxu0 }
 0x317   : > { %v934_v55 = vadd.f32 %v933_v46, %v914_v54 }
 0x319   : > { %v938_v57 = vmul.f32 %v1364_v56, %v934_v55  ;;  %1029 = vmatpush.bf16.msrb.mxu2 %v1275_v63 }
 0x31b   : > { %948 = vrot.lane.b32.xlu1 %v938_v57, %s1445_s25 }
 0x31d   : > { %1030 = vmatpush.bf16.msrb.mxu2 %v1274_v0 }
 0x31e   : > { %v916_v58 = vpop.f32.mrf.mxu0 }
 0x321   : > { %1031 = vmatpush.bf16.msrb.mxu2 %v1273_v1 }
 0x325   : > { %1032 = vmatpush.bf16.msrb.mxu2 %v1272_v2 }
 0x341   : > { %v941_v3 = vpop.permute.xlu2 %940 }
 0x342   : > { %v951_v5 = vsel %vm498_vm0, %v604_v53, %v941_v3 }
 0x36d   : > { %v945_v4 = vpop.permute.xlu0 %944 }
 0x36e   : > { %v953_v6 = vsel %vm952_vm6, %v951_v5, %v945_v4 }
 0x38d   : > { %v949_v7 = vpop.permute.xlu1 %948 }
 0x38e   : > { %v955_v8 = vsel %vm954_vm7, %v953_v6, %v949_v7 }
 0x38f   : > { %v956_v9 = vpack.c.bf16 %v955_v8, %v955_v8 }
 0x391   : > { %1033 = vmatmul.bf16.vlgmr.msrb.gmra.mxu2 %v956_v9 }
 0x414   : > { %v1034_v13 = vpop.f32.mrf.mxu2 }
 0x415   : > { %v1035_v14 = vadd.f32 %v1340_v10, %v1034_v13 }
 0x417   : > { %1038 = vst [vmem:[%s407_s27] sm:$0xff] %v1035_v14 }
 0x418   : > { %1392 = shalt.err (!%p1389_p5)
}
 0x419   : > { %1281 = dma.vmem_to_hbm [thread:$0]  (%p1538_p4), %s1054_s26, 128, %s1056_s18, %s1040_s0  }
 0x41c   : > { %v1036_v11 = vpop.f32.mrf.mxu2 }
 0x41d PF: > { %p1287_p6 = scmp.ge.s32.totalorder %s1443_s14, 2  ;;  %s1067_s28 = sand.u32 1, %s1423_s30  }
 0x41e   : > { %s1068_s24 = scalar_lea.sflag [#allocation5], %s1067_s28 }
 0x41f   : > { %p1284_p7 = pnand %p1287_p6, %p1545_p8 }
 0x421   : > { %p1285_p9 = pneg %p1284_p7 }
 0x423   : > { %1418 = dma.done.wait (%p1285_p9), %s1068_s24, 128  }
 0x424   : > { %1420 = vsyncadd (%p1285_p9), %s1068_s24, 4294967168  ;;  %s22_s14 = sadd.s32 1, %s1443_s14   ;;  %s1798_s30 = smov %s1427_s10 }
 0x425   : > { %p19_p10 = scmp.ge.s32.totalorder %s22_s14, 4   ;;  %s1799_s10 = smov %s1431_s11 }
 0x426   : > { %s1800_s11 = smov %s1551_s22  ;;  %s1801_s12 = smov %s1439_s13 }
 0x427   : > { %s1802_s13 = smov %s1804_s17  ;;  %21 = sbr.rel (!%p19_p10) target bundleno = 7 (0x7), region = 128 }
 0x42c   :  { %1074 = vsyncpa [#allocation5], 1 }
 0x42d   :  { %1076 = vsyncpa [#allocation5 + $0x1], 1 }

</bundles_post_ra>
